<compile_context>
chip_gen: v7x
topology: tpu7x:2x2x1
jax: 0.10.0
libtpu: 0.0.40
codegen_flags: <defaults>
</compile_context>

<pallas_src>
import functools
import math

import jax
import jax.numpy as jnp
from jax import lax
from jax.experimental import pallas as pl
from jax.experimental.pallas import tpu as pltpu


# ----------------------------- config (small, synthetic) -----------------------------
VOCAB_SIZE = 30          # ProtBert vocab is 30 tokens
MAX_POS = 40
TYPE_VOCAB = 2
HIDDEN = 32
NUM_HEADS = 2
HEAD_DIM = HIDDEN // NUM_HEADS
INTERMEDIATE = 64
NUM_LAYERS = 2
FC_OUT = 128
LN_EPS = 1e-12           # BERT default layer_norm_eps


# ----------------------------- in-kernel helpers -----------------------------
def _layernorm(x, g, b, eps=LN_EPS):
    mu = jnp.mean(x, axis=-1, keepdims=True)
    xc = x - mu
    var = jnp.mean(xc * xc, axis=-1, keepdims=True)
    return xc * lax.rsqrt(var + eps) * g + b


def _gelu_exact(x):
    # HF BERT "gelu" = exact erf-based GELU.
    return 0.5 * x * (1.0 + lax.erf(x * (1.0 / math.sqrt(2.0))))


# ----------------------------- fused forward kernel -----------------------------
def _bert_forward_kernel(
    emb_ref, mask_ref,
    emb_ln_g_ref, emb_ln_b_ref,
    qkv_w_ref, qkv_b_ref, o_w_ref, o_b_ref,
    ln1_g_ref, ln1_b_ref,
    i_w_ref, i_b_ref, f_w_ref, f_b_ref,
    ln2_g_ref, ln2_b_ref,
    pool_w_ref, pool_b_ref, fc_w_ref, fc_b_ref,
    out_ref,
    *, batch, seq, hidden, n_heads, head_dim, n_layers,
):
    scale = 1.0 / math.sqrt(head_dim)

    # embeddings LayerNorm (no residual)
    x = _layernorm(emb_ref[...], emb_ln_g_ref[...], emb_ln_b_ref[...])   # (B*S, H)
    mask = mask_ref[...]                                                  # (B, S) additive bias

    for l in range(n_layers):
        # ---- fused QKV projection: (B*S, 3H) ----
        qkv = jnp.dot(x, qkv_w_ref[l], preferred_element_type=jnp.float32) + qkv_b_ref[l]
        q_all = qkv[:, 0:hidden]
        k_all = qkv[:, hidden:2 * hidden]
        v_all = qkv[:, 2 * hidden:3 * hidden]

        # ---- multi-head attention via static (batch, head) slices ----
        ctx_rows = []
        for b in range(batch):
            r0, r1 = b * seq, (b + 1) * seq
            mask_b = mask[b:b + 1, :]                                     # (1, S)
            head_ctx = []
            for h in range(n_heads):
                c0, c1 = h * head_dim, (h + 1) * head_dim
                q_bh = q_all[r0:r1, c0:c1]                                # (S, Dh)
                k_bh = k_all[r0:r1, c0:c1]
                v_bh = v_all[r0:r1, c0:c1]
                # q @ k^T without explicit transpose
                s = lax.dot_general(q_bh, k_bh, (((1,), (1,)), ((), ())),
                                    preferred_element_type=jnp.float32) * scale
                s = s + mask_b                                            # broadcast over rows
                s = s - jnp.max(s, axis=-1, keepdims=True)
                e = jnp.exp(s)
                inv = pl.reciprocal(jnp.sum(e, axis=-1, keepdims=True), approx=True)
                p = e * inv
                head_ctx.append(
                    jnp.dot(p, v_bh, preferred_element_type=jnp.float32))  # (S, Dh)
            ctx_rows.append(jnp.concatenate(head_ctx, axis=-1))            # (S, H)
        ctx = jnp.concatenate(ctx_rows, axis=0)                            # (B*S, H)

        # ---- attention output projection + LN1 ----
        attn_out = jnp.dot(ctx, o_w_ref[l], preferred_element_type=jnp.float32) + o_b_ref[l]
        x = _layernorm(attn_out + x, ln1_g_ref[l], ln1_b_ref[l])

        # ---- FFN (exact GELU) + LN2 ----
        inter = jnp.dot(x, i_w_ref[l], preferred_element_type=jnp.float32) + i_b_ref[l]
        inter = _gelu_exact(inter)
        ffn = jnp.dot(inter, f_w_ref[l], preferred_element_type=jnp.float32) + f_b_ref[l]
        x = _layernorm(ffn + x, ln2_g_ref[l], ln2_b_ref[l])

    # ---- pooler (tanh dense on [CLS]) + final fc, fused in-kernel ----
    cls = jnp.concatenate([x[b * seq:b * seq + 1, :] for b in range(batch)], axis=0)  # (B, H)
    pooled = jnp.tanh(
        jnp.dot(cls, pool_w_ref[...], preferred_element_type=jnp.float32) + pool_b_ref[...])
    out = jnp.dot(pooled, fc_w_ref[...], preferred_element_type=jnp.float32) + fc_b_ref[...]
    out_ref[...] = out.astype(out_ref.dtype)                               # (B, 128) lane-dense


# ----------------------------- parameters -----------------------------
def init_params(key):
    ks = iter(jax.random.split(key, 16))

    def w(k, shape):
        return 0.02 * jax.random.normal(k, shape, dtype=jnp.float32)

    return {
        "word_emb": w(next(ks), (VOCAB_SIZE, HIDDEN)),
        "pos_emb": w(next(ks), (MAX_POS, HIDDEN)),
        "type_emb": w(next(ks), (TYPE_VOCAB, HIDDEN)),
        "emb_ln_g": jnp.ones((1, HIDDEN), jnp.float32),
        "emb_ln_b": jnp.zeros((1, HIDDEN), jnp.float32),
        # per-layer weights stacked on a leading layer axis; QKV merged to (H, 3H)
        "qkv_w": w(next(ks), (NUM_LAYERS, HIDDEN, 3 * HIDDEN)),
        "qkv_b": jnp.zeros((NUM_LAYERS, 1, 3 * HIDDEN), jnp.float32),
        "o_w": w(next(ks), (NUM_LAYERS, HIDDEN, HIDDEN)),
        "o_b": jnp.zeros((NUM_LAYERS, 1, HIDDEN), jnp.float32),
        "ln1_g": jnp.ones((NUM_LAYERS, 1, HIDDEN), jnp.float32),
        "ln1_b": jnp.zeros((NUM_LAYERS, 1, HIDDEN), jnp.float32),
        "i_w": w(next(ks), (NUM_LAYERS, HIDDEN, INTERMEDIATE)),
        "i_b": jnp.zeros((NUM_LAYERS, 1, INTERMEDIATE), jnp.float32),
        "f_w": w(next(ks), (NUM_LAYERS, INTERMEDIATE, HIDDEN)),
        "f_b": jnp.zeros((NUM_LAYERS, 1, HIDDEN), jnp.float32),
        "ln2_g": jnp.ones((NUM_LAYERS, 1, HIDDEN), jnp.float32),
        "ln2_b": jnp.zeros((NUM_LAYERS, 1, HIDDEN), jnp.float32),
        "pool_w": w(next(ks), (HIDDEN, HIDDEN)),                           # BERT pooler
        "pool_b": jnp.zeros((1, HIDDEN), jnp.float32),
        "fc_w": w(next(ks), (HIDDEN, FC_OUT)),                             # self.fc
        "fc_b": jnp.zeros((1, FC_OUT), jnp.float32),
    }


# ----------------------------- forward pass -----------------------------
def fine_tune_protein_bert_forward(params, input_ids, attention_mask):
    """Equivalent of FineTuneProteinBertModel.forward (eval mode, no dropout)."""
    B, S = input_ids.shape

    # TODO(synk): embedding table gather (lookup) stays in plain JAX glue.
    pos_ids = jnp.arange(S, dtype=jnp.int32)
    emb = (jnp.take(params["word_emb"], input_ids, axis=0)
           + params["pos_emb"][pos_ids][None, :, :]
           + params["type_emb"][0][None, None, :])                        # (B, S, H)
    emb = emb.reshape(B * S, HIDDEN)

    # additive attention mask bias, (B, S): 0 for keep, -10000 for masked
    mask_bias = (1.0 - attention_mask.astype(jnp.float32)) * -10000.0

    kernel = functools.partial(
        _bert_forward_kernel,
        batch=B, seq=S, hidden=HIDDEN, n_heads=NUM_HEADS,
        head_dim=HEAD_DIM, n_layers=NUM_LAYERS,
    )
    # Single fused pallas_call: all weights (~70 KB) + activations live in VMEM.
    return pl.pallas_call(
        kernel,
        out_shape=jax.ShapeDtypeStruct((B, FC_OUT), jnp.float32),
        compiler_params=pltpu.CompilerParams(vmem_limit_bytes=16 * 1024 * 1024),
    )(
        emb, mask_bias,
        params["emb_ln_g"], params["emb_ln_b"],
        params["qkv_w"], params["qkv_b"], params["o_w"], params["o_b"],
        params["ln1_g"], params["ln1_b"],
        params["i_w"], params["i_b"], params["f_w"], params["f_b"],
        params["ln2_g"], params["ln2_b"],
        params["pool_w"], params["pool_b"], params["fc_w"], params["fc_b"],
    )


# ----------------------------- demo -----------------------------
if __name__ == "__main__":
    key = jax.random.PRNGKey(0)
    k_params, k_ids = jax.random.split(key)

    params = init_params(k_params)

    B, S = 2, 8
    input_ids = jax.random.randint(k_ids, (B, S), 0, VOCAB_SIZE, dtype=jnp.int32)
    attention_mask = jnp.array(
        [[1, 1, 1, 1, 1, 1, 1, 1],
         [1, 1, 1, 1, 1, 1, 0, 0]], dtype=jnp.int32)

    fwd = jax.jit(fine_tune_protein_bert_forward)
    out = fwd(params, input_ids, attention_mask)
    out = jax.block_until_ready(out)

    assert out.shape == (B, FC_OUT)
    assert out.dtype == jnp.float32
    assert bool(jnp.all(jnp.isfinite(out)))
    print("KERNEL_OK")
</pallas_src>

<mosaic_0001>
module attributes {stable_mosaic.version = 11 : i64} {
  func.func @_bert_forward_kernel(%arg0: memref<16x32xf32, #tpu.memory_space<vmem>>, %arg1: memref<2x8xf32, #tpu.memory_space<vmem>>, %arg2: memref<1x32xf32, #tpu.memory_space<vmem>>, %arg3: memref<1x32xf32, #tpu.memory_space<vmem>>, %arg4: memref<2x32x96xf32, #tpu.memory_space<vmem>>, %arg5: memref<2x1x96xf32, #tpu.memory_space<vmem>>, %arg6: memref<2x32x32xf32, #tpu.memory_space<vmem>>, %arg7: memref<2x1x32xf32, #tpu.memory_space<vmem>>, %arg8: memref<2x1x32xf32, #tpu.memory_space<vmem>>, %arg9: memref<2x1x32xf32, #tpu.memory_space<vmem>>, %arg10: memref<2x32x64xf32, #tpu.memory_space<vmem>>, %arg11: memref<2x1x64xf32, #tpu.memory_space<vmem>>, %arg12: memref<2x64x32xf32, #tpu.memory_space<vmem>>, %arg13: memref<2x1x32xf32, #tpu.memory_space<vmem>>, %arg14: memref<2x1x32xf32, #tpu.memory_space<vmem>>, %arg15: memref<2x1x32xf32, #tpu.memory_space<vmem>>, %arg16: memref<32x32xf32, #tpu.memory_space<vmem>>, %arg17: memref<1x32xf32, #tpu.memory_space<vmem>>, %arg18: memref<32x128xf32, #tpu.memory_space<vmem>>, %arg19: memref<1x128xf32, #tpu.memory_space<vmem>>, %arg20: memref<2x128xf32, #tpu.memory_space<vmem>>) attributes {dimension_semantics = [], scalar_prefetch = 0 : i64, scratch_operands = 0 : i64, tpu.core_type = #tpu.core_type<tc>} {
    %c0 = arith.constant 0 : index
    %c0_0 = arith.constant 0 : index
    %0 = vector.load %arg0[%c0, %c0_0] : memref<16x32xf32, #tpu.memory_space<vmem>>, vector<16x32xf32>
    %c0_1 = arith.constant 0 : index
    %c0_2 = arith.constant 0 : index
    %1 = vector.load %arg2[%c0_1, %c0_2] : memref<1x32xf32, #tpu.memory_space<vmem>>, vector<1x32xf32>
    %c0_3 = arith.constant 0 : index
    %c0_4 = arith.constant 0 : index
    %2 = vector.load %arg3[%c0_3, %c0_4] : memref<1x32xf32, #tpu.memory_space<vmem>>, vector<1x32xf32>
    %cst = arith.constant dense<0.000000e+00> : vector<16xf32>
    %3 = vector.multi_reduction <add>, %0, %cst [1] : vector<16x32xf32> to vector<16xf32>
    %4 = vector.shape_cast %3 : vector<16xf32> to vector<16x1xf32>
    %cst_5 = arith.constant 3.200000e+01 : f32
    %5 = vector.broadcast %cst_5 : f32 to vector<16x1xf32>
    %6 = arith.divf %4, %5 : vector<16x1xf32>
    %7 = vector.broadcast %6 : vector<16x1xf32> to vector<16x32xf32>
    %8 = arith.subf %0, %7 : vector<16x32xf32>
    %9 = arith.mulf %8, %8 : vector<16x32xf32>
    %cst_6 = arith.constant dense<0.000000e+00> : vector<16xf32>
    %10 = vector.multi_reduction <add>, %9, %cst_6 [1] : vector<16x32xf32> to vector<16xf32>
    %11 = vector.shape_cast %10 : vector<16xf32> to vector<16x1xf32>
    %cst_7 = arith.constant 3.200000e+01 : f32
    %12 = vector.broadcast %cst_7 : f32 to vector<16x1xf32>
    %13 = arith.divf %11, %12 : vector<16x1xf32>
    %cst_8 = arith.constant 9.99999996E-13 : f32
    %14 = vector.broadcast %cst_8 : f32 to vector<16x1xf32>
    %15 = arith.addf %13, %14 : vector<16x1xf32>
    %16 = math.rsqrt %15 : vector<16x1xf32>
    %17 = vector.broadcast %16 : vector<16x1xf32> to vector<16x32xf32>
    %18 = arith.mulf %8, %17 : vector<16x32xf32>
    %19 = vector.broadcast %1 : vector<1x32xf32> to vector<16x32xf32>
    %20 = arith.mulf %18, %19 : vector<16x32xf32>
    %21 = vector.broadcast %2 : vector<1x32xf32> to vector<16x32xf32>
    %22 = arith.addf %20, %21 : vector<16x32xf32>
    %c0_9 = arith.constant 0 : index
    %c0_10 = arith.constant 0 : index
    %23 = vector.load %arg1[%c0_9, %c0_10] : memref<2x8xf32, #tpu.memory_space<vmem>>, vector<2x8xf32>
    %c0_11 = arith.constant 0 : index
    %c0_12 = arith.constant 0 : index
    %c0_13 = arith.constant 0 : index
    %24 = vector.load %arg4[%c0_11, %c0_12, %c0_13] : memref<2x32x96xf32, #tpu.memory_space<vmem>>, vector<1x32x96xf32>
    %25 = vector.shape_cast %24 : vector<1x32x96xf32> to vector<32x96xf32>
    %cst_14 = arith.constant dense<0.000000e+00> : vector<16x96xf32>
    %26 = tpu.matmul %22, %25, %cst_14 {dimension_numbers = #tpu.dot_dimension_numbers<[1], [0], [0], [1], [0, 0, 1, 1], [], []>} : vector<16x32xf32>, vector<32x96xf32>, vector<16x96xf32> -> vector<16x96xf32>
    %c0_15 = arith.constant 0 : index
    %c0_16 = arith.constant 0 : index
    %c0_17 = arith.constant 0 : index
    %27 = vector.load %arg5[%c0_15, %c0_16, %c0_17] : memref<2x1x96xf32, #tpu.memory_space<vmem>>, vector<1x1x96xf32>
    %28 = vector.shape_cast %27 : vector<1x1x96xf32> to vector<1x96xf32>
    %29 = vector.broadcast %28 : vector<1x96xf32> to vector<16x96xf32>
    %30 = arith.addf %26, %29 : vector<16x96xf32>
    %31 = vector.extract_strided_slice %30 {offsets = [0, 0], sizes = [16, 32], strides = [1, 1]} : vector<16x96xf32> to vector<16x32xf32>
    %32 = vector.extract_strided_slice %30 {offsets = [0, 32], sizes = [16, 32], strides = [1, 1]} : vector<16x96xf32> to vector<16x32xf32>
    %33 = vector.extract_strided_slice %30 {offsets = [0, 64], sizes = [16, 32], strides = [1, 1]} : vector<16x96xf32> to vector<16x32xf32>
    %34 = vector.extract_strided_slice %23 {offsets = [0, 0], sizes = [1, 8], strides = [1, 1]} : vector<2x8xf32> to vector<1x8xf32>
    %35 = vector.extract_strided_slice %31 {offsets = [0, 0], sizes = [8, 16], strides = [1, 1]} : vector<16x32xf32> to vector<8x16xf32>
    %36 = vector.extract_strided_slice %32 {offsets = [0, 0], sizes = [8, 16], strides = [1, 1]} : vector<16x32xf32> to vector<8x16xf32>
    %37 = vector.extract_strided_slice %33 {offsets = [0, 0], sizes = [8, 16], strides = [1, 1]} : vector<16x32xf32> to vector<8x16xf32>
    %cst_18 = arith.constant dense<0.000000e+00> : vector<8x8xf32>
    %38 = tpu.matmul %35, %36, %cst_18 {dimension_numbers = #tpu.dot_dimension_numbers<[1], [1], [0], [0], [0, 0, 1, 0], [], []>} : vector<8x16xf32>, vector<8x16xf32>, vector<8x8xf32> -> vector<8x8xf32>
    %cst_19 = arith.constant 2.500000e-01 : f32
    %39 = vector.broadcast %cst_19 : f32 to vector<8x8xf32>
    %40 = arith.mulf %38, %39 : vector<8x8xf32>
    %41 = vector.broadcast %34 : vector<1x8xf32> to vector<8x8xf32>
    %42 = arith.addf %40, %41 : vector<8x8xf32>
    %cst_20 = arith.constant dense<0xFF800000> : vector<8xf32>
    %43 = vector.multi_reduction <maximumf>, %42, %cst_20 [1] : vector<8x8xf32> to vector<8xf32>
    %44 = vector.shape_cast %43 : vector<8xf32> to vector<8x1xf32>
    %45 = vector.broadcast %44 : vector<8x1xf32> to vector<8x8xf32>
    %46 = arith.subf %42, %45 : vector<8x8xf32>
    %47 = math.exp %46 : vector<8x8xf32>
    %cst_21 = arith.constant dense<0.000000e+00> : vector<8xf32>
    %48 = vector.multi_reduction <add>, %47, %cst_21 [1] : vector<8x8xf32> to vector<8xf32>
    %49 = vector.shape_cast %48 : vector<8xf32> to vector<8x1xf32>
    %50 = tpu.reciprocal %49 {approx = true} : vector<8x1xf32> -> vector<8x1xf32>
    %51 = vector.broadcast %50 : vector<8x1xf32> to vector<8x8xf32>
    %52 = arith.mulf %47, %51 : vector<8x8xf32>
    %cst_22 = arith.constant dense<0.000000e+00> : vector<8x16xf32>
    %53 = tpu.matmul %52, %37, %cst_22 {dimension_numbers = #tpu.dot_dimension_numbers<[1], [0], [0], [1], [0, 0, 1, 1], [], []>} : vector<8x8xf32>, vector<8x16xf32>, vector<8x16xf32> -> vector<8x16xf32>
    %54 = vector.extract_strided_slice %31 {offsets = [0, 16], sizes = [8, 16], strides = [1, 1]} : vector<16x32xf32> to vector<8x16xf32>
    %55 = vector.extract_strided_slice %32 {offsets = [0, 16], sizes = [8, 16], strides = [1, 1]} : vector<16x32xf32> to vector<8x16xf32>
    %56 = vector.extract_strided_slice %33 {offsets = [0, 16], sizes = [8, 16], strides = [1, 1]} : vector<16x32xf32> to vector<8x16xf32>
    %cst_23 = arith.constant dense<0.000000e+00> : vector<8x8xf32>
    %57 = tpu.matmul %54, %55, %cst_23 {dimension_numbers = #tpu.dot_dimension_numbers<[1], [1], [0], [0], [0, 0, 1, 0], [], []>} : vector<8x16xf32>, vector<8x16xf32>, vector<8x8xf32> -> vector<8x8xf32>
    %cst_24 = arith.constant 2.500000e-01 : f32
    %58 = vector.broadcast %cst_24 : f32 to vector<8x8xf32>
    %59 = arith.mulf %57, %58 : vector<8x8xf32>
    %60 = vector.broadcast %34 : vector<1x8xf32> to vector<8x8xf32>
    %61 = arith.addf %59, %60 : vector<8x8xf32>
    %cst_25 = arith.constant dense<0xFF800000> : vector<8xf32>
    %62 = vector.multi_reduction <maximumf>, %61, %cst_25 [1] : vector<8x8xf32> to vector<8xf32>
    %63 = vector.shape_cast %62 : vector<8xf32> to vector<8x1xf32>
    %64 = vector.broadcast %63 : vector<8x1xf32> to vector<8x8xf32>
    %65 = arith.subf %61, %64 : vector<8x8xf32>
    %66 = math.exp %65 : vector<8x8xf32>
    %cst_26 = arith.constant dense<0.000000e+00> : vector<8xf32>
    %67 = vector.multi_reduction <add>, %66, %cst_26 [1] : vector<8x8xf32> to vector<8xf32>
    %68 = vector.shape_cast %67 : vector<8xf32> to vector<8x1xf32>
    %69 = tpu.reciprocal %68 {approx = true} : vector<8x1xf32> -> vector<8x1xf32>
    %70 = vector.broadcast %69 : vector<8x1xf32> to vector<8x8xf32>
    %71 = arith.mulf %66, %70 : vector<8x8xf32>
    %cst_27 = arith.constant dense<0.000000e+00> : vector<8x16xf32>
    %72 = tpu.matmul %71, %56, %cst_27 {dimension_numbers = #tpu.dot_dimension_numbers<[1], [0], [0], [1], [0, 0, 1, 1], [], []>} : vector<8x8xf32>, vector<8x16xf32>, vector<8x16xf32> -> vector<8x16xf32>
    %73 = tpu.concatenate %53, %72 in 1 : vector<8x16xf32>, vector<8x16xf32> -> vector<8x32xf32>
    %74 = vector.extract_strided_slice %23 {offsets = [1, 0], sizes = [1, 8], strides = [1, 1]} : vector<2x8xf32> to vector<1x8xf32>
    %75 = vector.extract_strided_slice %31 {offsets = [8, 0], sizes = [8, 16], strides = [1, 1]} : vector<16x32xf32> to vector<8x16xf32>
    %76 = vector.extract_strided_slice %32 {offsets = [8, 0], sizes = [8, 16], strides = [1, 1]} : vector<16x32xf32> to vector<8x16xf32>
    %77 = vector.extract_strided_slice %33 {offsets = [8, 0], sizes = [8, 16], strides = [1, 1]} : vector<16x32xf32> to vector<8x16xf32>
    %cst_28 = arith.constant dense<0.000000e+00> : vector<8x8xf32>
    %78 = tpu.matmul %75, %76, %cst_28 {dimension_numbers = #tpu.dot_dimension_numbers<[1], [1], [0], [0], [0, 0, 1, 0], [], []>} : vector<8x16xf32>, vector<8x16xf32>, vector<8x8xf32> -> vector<8x8xf32>
    %cst_29 = arith.constant 2.500000e-01 : f32
    %79 = vector.broadcast %cst_29 : f32 to vector<8x8xf32>
    %80 = arith.mulf %78, %79 : vector<8x8xf32>
    %81 = vector.broadcast %74 : vector<1x8xf32> to vector<8x8xf32>
    %82 = arith.addf %80, %81 : vector<8x8xf32>
    %cst_30 = arith.constant dense<0xFF800000> : vector<8xf32>
    %83 = vector.multi_reduction <maximumf>, %82, %cst_30 [1] : vector<8x8xf32> to vector<8xf32>
    %84 = vector.shape_cast %83 : vector<8xf32> to vector<8x1xf32>
    %85 = vector.broadcast %84 : vector<8x1xf32> to vector<8x8xf32>
    %86 = arith.subf %82, %85 : vector<8x8xf32>
    %87 = math.exp %86 : vector<8x8xf32>
    %cst_31 = arith.constant dense<0.000000e+00> : vector<8xf32>
    %88 = vector.multi_reduction <add>, %87, %cst_31 [1] : vector<8x8xf32> to vector<8xf32>
    %89 = vector.shape_cast %88 : vector<8xf32> to vector<8x1xf32>
    %90 = tpu.reciprocal %89 {approx = true} : vector<8x1xf32> -> vector<8x1xf32>
    %91 = vector.broadcast %90 : vector<8x1xf32> to vector<8x8xf32>
    %92 = arith.mulf %87, %91 : vector<8x8xf32>
    %cst_32 = arith.constant dense<0.000000e+00> : vector<8x16xf32>
    %93 = tpu.matmul %92, %77, %cst_32 {dimension_numbers = #tpu.dot_dimension_numbers<[1], [0], [0], [1], [0, 0, 1, 1], [], []>} : vector<8x8xf32>, vector<8x16xf32>, vector<8x16xf32> -> vector<8x16xf32>
    %94 = vector.extract_strided_slice %31 {offsets = [8, 16], sizes = [8, 16], strides = [1, 1]} : vector<16x32xf32> to vector<8x16xf32>
    %95 = vector.extract_strided_slice %32 {offsets = [8, 16], sizes = [8, 16], strides = [1, 1]} : vector<16x32xf32> to vector<8x16xf32>
    %96 = vector.extract_strided_slice %33 {offsets = [8, 16], sizes = [8, 16], strides = [1, 1]} : vector<16x32xf32> to vector<8x16xf32>
    %cst_33 = arith.constant dense<0.000000e+00> : vector<8x8xf32>
    %97 = tpu.matmul %94, %95, %cst_33 {dimension_numbers = #tpu.dot_dimension_numbers<[1], [1], [0], [0], [0, 0, 1, 0], [], []>} : vector<8x16xf32>, vector<8x16xf32>, vector<8x8xf32> -> vector<8x8xf32>
    %cst_34 = arith.constant 2.500000e-01 : f32
    %98 = vector.broadcast %cst_34 : f32 to vector<8x8xf32>
    %99 = arith.mulf %97, %98 : vector<8x8xf32>
    %100 = vector.broadcast %74 : vector<1x8xf32> to vector<8x8xf32>
    %101 = arith.addf %99, %100 : vector<8x8xf32>
    %cst_35 = arith.constant dense<0xFF800000> : vector<8xf32>
    %102 = vector.multi_reduction <maximumf>, %101, %cst_35 [1] : vector<8x8xf32> to vector<8xf32>
    %103 = vector.shape_cast %102 : vector<8xf32> to vector<8x1xf32>
    %104 = vector.broadcast %103 : vector<8x1xf32> to vector<8x8xf32>
    %105 = arith.subf %101, %104 : vector<8x8xf32>
    %106 = math.exp %105 : vector<8x8xf32>
    %cst_36 = arith.constant dense<0.000000e+00> : vector<8xf32>
    %107 = vector.multi_reduction <add>, %106, %cst_36 [1] : vector<8x8xf32> to vector<8xf32>
    %108 = vector.shape_cast %107 : vector<8xf32> to vector<8x1xf32>
    %109 = tpu.reciprocal %108 {approx = true} : vector<8x1xf32> -> vector<8x1xf32>
    %110 = vector.broadcast %109 : vector<8x1xf32> to vector<8x8xf32>
    %111 = arith.mulf %106, %110 : vector<8x8xf32>
    %cst_37 = arith.constant dense<0.000000e+00> : vector<8x16xf32>
    %112 = tpu.matmul %111, %96, %cst_37 {dimension_numbers = #tpu.dot_dimension_numbers<[1], [0], [0], [1], [0, 0, 1, 1], [], []>} : vector<8x8xf32>, vector<8x16xf32>, vector<8x16xf32> -> vector<8x16xf32>
    %113 = tpu.concatenate %93, %112 in 1 : vector<8x16xf32>, vector<8x16xf32> -> vector<8x32xf32>
    %114 = tpu.concatenate %73, %113 in 0 : vector<8x32xf32>, vector<8x32xf32> -> vector<16x32xf32>
    %c0_38 = arith.constant 0 : index
    %c0_39 = arith.constant 0 : index
    %c0_40 = arith.constant 0 : index
    %115 = vector.load %arg6[%c0_38, %c0_39, %c0_40] : memref<2x32x32xf32, #tpu.memory_space<vmem>>, vector<1x32x32xf32>
    %116 = vector.shape_cast %115 : vector<1x32x32xf32> to vector<32x32xf32>
    %cst_41 = arith.constant dense<0.000000e+00> : vector<16x32xf32>
    %117 = tpu.matmul %114, %116, %cst_41 {dimension_numbers = #tpu.dot_dimension_numbers<[1], [0], [0], [1], [0, 0, 1, 1], [], []>} : vector<16x32xf32>, vector<32x32xf32>, vector<16x32xf32> -> vector<16x32xf32>
    %c0_42 = arith.constant 0 : index
    %c0_43 = arith.constant 0 : index
    %c0_44 = arith.constant 0 : index
    %118 = vector.load %arg7[%c0_42, %c0_43, %c0_44] : memref<2x1x32xf32, #tpu.memory_space<vmem>>, vector<1x1x32xf32>
    %119 = vector.shape_cast %118 : vector<1x1x32xf32> to vector<1x32xf32>
    %120 = vector.broadcast %119 : vector<1x32xf32> to vector<16x32xf32>
    %121 = arith.addf %117, %120 : vector<16x32xf32>
    %122 = arith.addf %121, %22 : vector<16x32xf32>
    %c0_45 = arith.constant 0 : index
    %c0_46 = arith.constant 0 : index
    %c0_47 = arith.constant 0 : index
    %123 = vector.load %arg8[%c0_45, %c0_46, %c0_47] : memref<2x1x32xf32, #tpu.memory_space<vmem>>, vector<1x1x32xf32>
    %124 = vector.shape_cast %123 : vector<1x1x32xf32> to vector<1x32xf32>
    %c0_48 = arith.constant 0 : index
    %c0_49 = arith.constant 0 : index
    %c0_50 = arith.constant 0 : index
    %125 = vector.load %arg9[%c0_48, %c0_49, %c0_50] : memref<2x1x32xf32, #tpu.memory_space<vmem>>, vector<1x1x32xf32>
    %126 = vector.shape_cast %125 : vector<1x1x32xf32> to vector<1x32xf32>
    %cst_51 = arith.constant dense<0.000000e+00> : vector<16xf32>
    %127 = vector.multi_reduction <add>, %122, %cst_51 [1] : vector<16x32xf32> to vector<16xf32>
    %128 = vector.shape_cast %127 : vector<16xf32> to vector<16x1xf32>
    %cst_52 = arith.constant 3.200000e+01 : f32
    %129 = vector.broadcast %cst_52 : f32 to vector<16x1xf32>
    %130 = arith.divf %128, %129 : vector<16x1xf32>
    %131 = vector.broadcast %130 : vector<16x1xf32> to vector<16x32xf32>
    %132 = arith.subf %122, %131 : vector<16x32xf32>
    %133 = arith.mulf %132, %132 : vector<16x32xf32>
    %cst_53 = arith.constant dense<0.000000e+00> : vector<16xf32>
    %134 = vector.multi_reduction <add>, %133, %cst_53 [1] : vector<16x32xf32> to vector<16xf32>
    %135 = vector.shape_cast %134 : vector<16xf32> to vector<16x1xf32>
    %cst_54 = arith.constant 3.200000e+01 : f32
    %136 = vector.broadcast %cst_54 : f32 to vector<16x1xf32>
    %137 = arith.divf %135, %136 : vector<16x1xf32>
    %cst_55 = arith.constant 9.99999996E-13 : f32
    %138 = vector.broadcast %cst_55 : f32 to vector<16x1xf32>
    %139 = arith.addf %137, %138 : vector<16x1xf32>
    %140 = math.rsqrt %139 : vector<16x1xf32>
    %141 = vector.broadcast %140 : vector<16x1xf32> to vector<16x32xf32>
    %142 = arith.mulf %132, %141 : vector<16x32xf32>
    %143 = vector.broadcast %124 : vector<1x32xf32> to vector<16x32xf32>
    %144 = arith.mulf %142, %143 : vector<16x32xf32>
    %145 = vector.broadcast %126 : vector<1x32xf32> to vector<16x32xf32>
    %146 = arith.addf %144, %145 : vector<16x32xf32>
    %c0_56 = arith.constant 0 : index
    %c0_57 = arith.constant 0 : index
    %c0_58 = arith.constant 0 : index
    %147 = vector.load %arg10[%c0_56, %c0_57, %c0_58] : memref<2x32x64xf32, #tpu.memory_space<vmem>>, vector<1x32x64xf32>
    %148 = vector.shape_cast %147 : vector<1x32x64xf32> to vector<32x64xf32>
    %cst_59 = arith.constant dense<0.000000e+00> : vector<16x64xf32>
    %149 = tpu.matmul %146, %148, %cst_59 {dimension_numbers = #tpu.dot_dimension_numbers<[1], [0], [0], [1], [0, 0, 1, 1], [], []>} : vector<16x32xf32>, vector<32x64xf32>, vector<16x64xf32> -> vector<16x64xf32>
    %c0_60 = arith.constant 0 : index
    %c0_61 = arith.constant 0 : index
    %c0_62 = arith.constant 0 : index
    %150 = vector.load %arg11[%c0_60, %c0_61, %c0_62] : memref<2x1x64xf32, #tpu.memory_space<vmem>>, vector<1x1x64xf32>
    %151 = vector.shape_cast %150 : vector<1x1x64xf32> to vector<1x64xf32>
    %152 = vector.broadcast %151 : vector<1x64xf32> to vector<16x64xf32>
    %153 = arith.addf %149, %152 : vector<16x64xf32>
    %cst_63 = arith.constant 5.000000e-01 : f32
    %154 = vector.broadcast %cst_63 : f32 to vector<16x64xf32>
    %155 = arith.mulf %154, %153 : vector<16x64xf32>
    %cst_64 = arith.constant 0.707106769 : f32
    %156 = vector.broadcast %cst_64 : f32 to vector<16x64xf32>
    %157 = arith.mulf %153, %156 : vector<16x64xf32>
    %158 = math.erf %157 : vector<16x64xf32>
    %cst_65 = arith.constant 1.000000e+00 : f32
    %159 = vector.broadcast %cst_65 : f32 to vector<16x64xf32>
    %160 = arith.addf %159, %158 : vector<16x64xf32>
    %161 = arith.mulf %155, %160 : vector<16x64xf32>
    %c0_66 = arith.constant 0 : index
    %c0_67 = arith.constant 0 : index
    %c0_68 = arith.constant 0 : index
    %162 = vector.load %arg12[%c0_66, %c0_67, %c0_68] : memref<2x64x32xf32, #tpu.memory_space<vmem>>, vector<1x64x32xf32>
    %163 = vector.shape_cast %162 : vector<1x64x32xf32> to vector<64x32xf32>
    %cst_69 = arith.constant dense<0.000000e+00> : vector<16x32xf32>
    %164 = tpu.matmul %161, %163, %cst_69 {dimension_numbers = #tpu.dot_dimension_numbers<[1], [0], [0], [1], [0, 0, 1, 1], [], []>} : vector<16x64xf32>, vector<64x32xf32>, vector<16x32xf32> -> vector<16x32xf32>
    %c0_70 = arith.constant 0 : index
    %c0_71 = arith.constant 0 : index
    %c0_72 = arith.constant 0 : index
    %165 = vector.load %arg13[%c0_70, %c0_71, %c0_72] : memref<2x1x32xf32, #tpu.memory_space<vmem>>, vector<1x1x32xf32>
    %166 = vector.shape_cast %165 : vector<1x1x32xf32> to vector<1x32xf32>
    %167 = vector.broadcast %166 : vector<1x32xf32> to vector<16x32xf32>
    %168 = arith.addf %164, %167 : vector<16x32xf32>
    %169 = arith.addf %168, %146 : vector<16x32xf32>
    %c0_73 = arith.constant 0 : index
    %c0_74 = arith.constant 0 : index
    %c0_75 = arith.constant 0 : index
    %170 = vector.load %arg14[%c0_73, %c0_74, %c0_75] : memref<2x1x32xf32, #tpu.memory_space<vmem>>, vector<1x1x32xf32>
    %171 = vector.shape_cast %170 : vector<1x1x32xf32> to vector<1x32xf32>
    %c0_76 = arith.constant 0 : index
    %c0_77 = arith.constant 0 : index
    %c0_78 = arith.constant 0 : index
    %172 = vector.load %arg15[%c0_76, %c0_77, %c0_78] : memref<2x1x32xf32, #tpu.memory_space<vmem>>, vector<1x1x32xf32>
    %173 = vector.shape_cast %172 : vector<1x1x32xf32> to vector<1x32xf32>
    %cst_79 = arith.constant dense<0.000000e+00> : vector<16xf32>
    %174 = vector.multi_reduction <add>, %169, %cst_79 [1] : vector<16x32xf32> to vector<16xf32>
    %175 = vector.shape_cast %174 : vector<16xf32> to vector<16x1xf32>
    %cst_80 = arith.constant 3.200000e+01 : f32
    %176 = vector.broadcast %cst_80 : f32 to vector<16x1xf32>
    %177 = arith.divf %175, %176 : vector<16x1xf32>
    %178 = vector.broadcast %177 : vector<16x1xf32> to vector<16x32xf32>
    %179 = arith.subf %169, %178 : vector<16x32xf32>
    %180 = arith.mulf %179, %179 : vector<16x32xf32>
    %cst_81 = arith.constant dense<0.000000e+00> : vector<16xf32>
    %181 = vector.multi_reduction <add>, %180, %cst_81 [1] : vector<16x32xf32> to vector<16xf32>
    %182 = vector.shape_cast %181 : vector<16xf32> to vector<16x1xf32>
    %cst_82 = arith.constant 3.200000e+01 : f32
    %183 = vector.broadcast %cst_82 : f32 to vector<16x1xf32>
    %184 = arith.divf %182, %183 : vector<16x1xf32>
    %cst_83 = arith.constant 9.99999996E-13 : f32
    %185 = vector.broadcast %cst_83 : f32 to vector<16x1xf32>
    %186 = arith.addf %184, %185 : vector<16x1xf32>
    %187 = math.rsqrt %186 : vector<16x1xf32>
    %188 = vector.broadcast %187 : vector<16x1xf32> to vector<16x32xf32>
    %189 = arith.mulf %179, %188 : vector<16x32xf32>
    %190 = vector.broadcast %171 : vector<1x32xf32> to vector<16x32xf32>
    %191 = arith.mulf %189, %190 : vector<16x32xf32>
    %192 = vector.broadcast %173 : vector<1x32xf32> to vector<16x32xf32>
    %193 = arith.addf %191, %192 : vector<16x32xf32>
    %c1 = arith.constant 1 : index
    %c0_84 = arith.constant 0 : index
    %c0_85 = arith.constant 0 : index
    %194 = vector.load %arg4[%c1, %c0_84, %c0_85] : memref<2x32x96xf32, #tpu.memory_space<vmem>>, vector<1x32x96xf32>
    %195 = vector.shape_cast %194 : vector<1x32x96xf32> to vector<32x96xf32>
    %cst_86 = arith.constant dense<0.000000e+00> : vector<16x96xf32>
    %196 = tpu.matmul %193, %195, %cst_86 {dimension_numbers = #tpu.dot_dimension_numbers<[1], [0], [0], [1], [0, 0, 1, 1], [], []>} : vector<16x32xf32>, vector<32x96xf32>, vector<16x96xf32> -> vector<16x96xf32>
    %c1_87 = arith.constant 1 : index
    %c0_88 = arith.constant 0 : index
    %c0_89 = arith.constant 0 : index
    %197 = vector.load %arg5[%c1_87, %c0_88, %c0_89] : memref<2x1x96xf32, #tpu.memory_space<vmem>>, vector<1x1x96xf32>
    %198 = vector.shape_cast %197 : vector<1x1x96xf32> to vector<1x96xf32>
    %199 = vector.broadcast %198 : vector<1x96xf32> to vector<16x96xf32>
    %200 = arith.addf %196, %199 : vector<16x96xf32>
    %201 = vector.extract_strided_slice %200 {offsets = [0, 0], sizes = [16, 32], strides = [1, 1]} : vector<16x96xf32> to vector<16x32xf32>
    %202 = vector.extract_strided_slice %200 {offsets = [0, 32], sizes = [16, 32], strides = [1, 1]} : vector<16x96xf32> to vector<16x32xf32>
    %203 = vector.extract_strided_slice %200 {offsets = [0, 64], sizes = [16, 32], strides = [1, 1]} : vector<16x96xf32> to vector<16x32xf32>
    %204 = vector.extract_strided_slice %23 {offsets = [0, 0], sizes = [1, 8], strides = [1, 1]} : vector<2x8xf32> to vector<1x8xf32>
    %205 = vector.extract_strided_slice %201 {offsets = [0, 0], sizes = [8, 16], strides = [1, 1]} : vector<16x32xf32> to vector<8x16xf32>
    %206 = vector.extract_strided_slice %202 {offsets = [0, 0], sizes = [8, 16], strides = [1, 1]} : vector<16x32xf32> to vector<8x16xf32>
    %207 = vector.extract_strided_slice %203 {offsets = [0, 0], sizes = [8, 16], strides = [1, 1]} : vector<16x32xf32> to vector<8x16xf32>
    %cst_90 = arith.constant dense<0.000000e+00> : vector<8x8xf32>
    %208 = tpu.matmul %205, %206, %cst_90 {dimension_numbers = #tpu.dot_dimension_numbers<[1], [1], [0], [0], [0, 0, 1, 0], [], []>} : vector<8x16xf32>, vector<8x16xf32>, vector<8x8xf32> -> vector<8x8xf32>
    %cst_91 = arith.constant 2.500000e-01 : f32
    %209 = vector.broadcast %cst_91 : f32 to vector<8x8xf32>
    %210 = arith.mulf %208, %209 : vector<8x8xf32>
    %211 = vector.broadcast %204 : vector<1x8xf32> to vector<8x8xf32>
    %212 = arith.addf %210, %211 : vector<8x8xf32>
    %cst_92 = arith.constant dense<0xFF800000> : vector<8xf32>
    %213 = vector.multi_reduction <maximumf>, %212, %cst_92 [1] : vector<8x8xf32> to vector<8xf32>
    %214 = vector.shape_cast %213 : vector<8xf32> to vector<8x1xf32>
    %215 = vector.broadcast %214 : vector<8x1xf32> to vector<8x8xf32>
    %216 = arith.subf %212, %215 : vector<8x8xf32>
    %217 = math.exp %216 : vector<8x8xf32>
    %cst_93 = arith.constant dense<0.000000e+00> : vector<8xf32>
    %218 = vector.multi_reduction <add>, %217, %cst_93 [1] : vector<8x8xf32> to vector<8xf32>
    %219 = vector.shape_cast %218 : vector<8xf32> to vector<8x1xf32>
    %220 = tpu.reciprocal %219 {approx = true} : vector<8x1xf32> -> vector<8x1xf32>
    %221 = vector.broadcast %220 : vector<8x1xf32> to vector<8x8xf32>
    %222 = arith.mulf %217, %221 : vector<8x8xf32>
    %cst_94 = arith.constant dense<0.000000e+00> : vector<8x16xf32>
    %223 = tpu.matmul %222, %207, %cst_94 {dimension_numbers = #tpu.dot_dimension_numbers<[1], [0], [0], [1], [0, 0, 1, 1], [], []>} : vector<8x8xf32>, vector<8x16xf32>, vector<8x16xf32> -> vector<8x16xf32>
    %224 = vector.extract_strided_slice %201 {offsets = [0, 16], sizes = [8, 16], strides = [1, 1]} : vector<16x32xf32> to vector<8x16xf32>
    %225 = vector.extract_strided_slice %202 {offsets = [0, 16], sizes = [8, 16], strides = [1, 1]} : vector<16x32xf32> to vector<8x16xf32>
    %226 = vector.extract_strided_slice %203 {offsets = [0, 16], sizes = [8, 16], strides = [1, 1]} : vector<16x32xf32> to vector<8x16xf32>
    %cst_95 = arith.constant dense<0.000000e+00> : vector<8x8xf32>
    %227 = tpu.matmul %224, %225, %cst_95 {dimension_numbers = #tpu.dot_dimension_numbers<[1], [1], [0], [0], [0, 0, 1, 0], [], []>} : vector<8x16xf32>, vector<8x16xf32>, vector<8x8xf32> -> vector<8x8xf32>
    %cst_96 = arith.constant 2.500000e-01 : f32
    %228 = vector.broadcast %cst_96 : f32 to vector<8x8xf32>
    %229 = arith.mulf %227, %228 : vector<8x8xf32>
    %230 = vector.broadcast %204 : vector<1x8xf32> to vector<8x8xf32>
    %231 = arith.addf %229, %230 : vector<8x8xf32>
    %cst_97 = arith.constant dense<0xFF800000> : vector<8xf32>
    %232 = vector.multi_reduction <maximumf>, %231, %cst_97 [1] : vector<8x8xf32> to vector<8xf32>
    %233 = vector.shape_cast %232 : vector<8xf32> to vector<8x1xf32>
    %234 = vector.broadcast %233 : vector<8x1xf32> to vector<8x8xf32>
    %235 = arith.subf %231, %234 : vector<8x8xf32>
    %236 = math.exp %235 : vector<8x8xf32>
    %cst_98 = arith.constant dense<0.000000e+00> : vector<8xf32>
    %237 = vector.multi_reduction <add>, %236, %cst_98 [1] : vector<8x8xf32> to vector<8xf32>
    %238 = vector.shape_cast %237 : vector<8xf32> to vector<8x1xf32>
    %239 = tpu.reciprocal %238 {approx = true} : vector<8x1xf32> -> vector<8x1xf32>
    %240 = vector.broadcast %239 : vector<8x1xf32> to vector<8x8xf32>
    %241 = arith.mulf %236, %240 : vector<8x8xf32>
    %cst_99 = arith.constant dense<0.000000e+00> : vector<8x16xf32>
    %242 = tpu.matmul %241, %226, %cst_99 {dimension_numbers = #tpu.dot_dimension_numbers<[1], [0], [0], [1], [0, 0, 1, 1], [], []>} : vector<8x8xf32>, vector<8x16xf32>, vector<8x16xf32> -> vector<8x16xf32>
    %243 = tpu.concatenate %223, %242 in 1 : vector<8x16xf32>, vector<8x16xf32> -> vector<8x32xf32>
    %244 = vector.extract_strided_slice %23 {offsets = [1, 0], sizes = [1, 8], strides = [1, 1]} : vector<2x8xf32> to vector<1x8xf32>
    %245 = vector.extract_strided_slice %201 {offsets = [8, 0], sizes = [8, 16], strides = [1, 1]} : vector<16x32xf32> to vector<8x16xf32>
    %246 = vector.extract_strided_slice %202 {offsets = [8, 0], sizes = [8, 16], strides = [1, 1]} : vector<16x32xf32> to vector<8x16xf32>
    %247 = vector.extract_strided_slice %203 {offsets = [8, 0], sizes = [8, 16], strides = [1, 1]} : vector<16x32xf32> to vector<8x16xf32>
    %cst_100 = arith.constant dense<0.000000e+00> : vector<8x8xf32>
    %248 = tpu.matmul %245, %246, %cst_100 {dimension_numbers = #tpu.dot_dimension_numbers<[1], [1], [0], [0], [0, 0, 1, 0], [], []>} : vector<8x16xf32>, vector<8x16xf32>, vector<8x8xf32> -> vector<8x8xf32>
    %cst_101 = arith.constant 2.500000e-01 : f32
    %249 = vector.broadcast %cst_101 : f32 to vector<8x8xf32>
    %250 = arith.mulf %248, %249 : vector<8x8xf32>
    %251 = vector.broadcast %244 : vector<1x8xf32> to vector<8x8xf32>
    %252 = arith.addf %250, %251 : vector<8x8xf32>
    %cst_102 = arith.constant dense<0xFF800000> : vector<8xf32>
    %253 = vector.multi_reduction <maximumf>, %252, %cst_102 [1] : vector<8x8xf32> to vector<8xf32>
    %254 = vector.shape_cast %253 : vector<8xf32> to vector<8x1xf32>
    %255 = vector.broadcast %254 : vector<8x1xf32> to vector<8x8xf32>
    %256 = arith.subf %252, %255 : vector<8x8xf32>
    %257 = math.exp %256 : vector<8x8xf32>
    %cst_103 = arith.constant dense<0.000000e+00> : vector<8xf32>
    %258 = vector.multi_reduction <add>, %257, %cst_103 [1] : vector<8x8xf32> to vector<8xf32>
    %259 = vector.shape_cast %258 : vector<8xf32> to vector<8x1xf32>
    %260 = tpu.reciprocal %259 {approx = true} : vector<8x1xf32> -> vector<8x1xf32>
    %261 = vector.broadcast %260 : vector<8x1xf32> to vector<8x8xf32>
    %262 = arith.mulf %257, %261 : vector<8x8xf32>
    %cst_104 = arith.constant dense<0.000000e+00> : vector<8x16xf32>
    %263 = tpu.matmul %262, %247, %cst_104 {dimension_numbers = #tpu.dot_dimension_numbers<[1], [0], [0], [1], [0, 0, 1, 1], [], []>} : vector<8x8xf32>, vector<8x16xf32>, vector<8x16xf32> -> vector<8x16xf32>
    %264 = vector.extract_strided_slice %201 {offsets = [8, 16], sizes = [8, 16], strides = [1, 1]} : vector<16x32xf32> to vector<8x16xf32>
    %265 = vector.extract_strided_slice %202 {offsets = [8, 16], sizes = [8, 16], strides = [1, 1]} : vector<16x32xf32> to vector<8x16xf32>
    %266 = vector.extract_strided_slice %203 {offsets = [8, 16], sizes = [8, 16], strides = [1, 1]} : vector<16x32xf32> to vector<8x16xf32>
    %cst_105 = arith.constant dense<0.000000e+00> : vector<8x8xf32>
    %267 = tpu.matmul %264, %265, %cst_105 {dimension_numbers = #tpu.dot_dimension_numbers<[1], [1], [0], [0], [0, 0, 1, 0], [], []>} : vector<8x16xf32>, vector<8x16xf32>, vector<8x8xf32> -> vector<8x8xf32>
    %cst_106 = arith.constant 2.500000e-01 : f32
    %268 = vector.broadcast %cst_106 : f32 to vector<8x8xf32>
    %269 = arith.mulf %267, %268 : vector<8x8xf32>
    %270 = vector.broadcast %244 : vector<1x8xf32> to vector<8x8xf32>
    %271 = arith.addf %269, %270 : vector<8x8xf32>
    %cst_107 = arith.constant dense<0xFF800000> : vector<8xf32>
    %272 = vector.multi_reduction <maximumf>, %271, %cst_107 [1] : vector<8x8xf32> to vector<8xf32>
    %273 = vector.shape_cast %272 : vector<8xf32> to vector<8x1xf32>
    %274 = vector.broadcast %273 : vector<8x1xf32> to vector<8x8xf32>
    %275 = arith.subf %271, %274 : vector<8x8xf32>
    %276 = math.exp %275 : vector<8x8xf32>
    %cst_108 = arith.constant dense<0.000000e+00> : vector<8xf32>
    %277 = vector.multi_reduction <add>, %276, %cst_108 [1] : vector<8x8xf32> to vector<8xf32>
    %278 = vector.shape_cast %277 : vector<8xf32> to vector<8x1xf32>
    %279 = tpu.reciprocal %278 {approx = true} : vector<8x1xf32> -> vector<8x1xf32>
    %280 = vector.broadcast %279 : vector<8x1xf32> to vector<8x8xf32>
    %281 = arith.mulf %276, %280 : vector<8x8xf32>
    %cst_109 = arith.constant dense<0.000000e+00> : vector<8x16xf32>
    %282 = tpu.matmul %281, %266, %cst_109 {dimension_numbers = #tpu.dot_dimension_numbers<[1], [0], [0], [1], [0, 0, 1, 1], [], []>} : vector<8x8xf32>, vector<8x16xf32>, vector<8x16xf32> -> vector<8x16xf32>
    %283 = tpu.concatenate %263, %282 in 1 : vector<8x16xf32>, vector<8x16xf32> -> vector<8x32xf32>
    %284 = tpu.concatenate %243, %283 in 0 : vector<8x32xf32>, vector<8x32xf32> -> vector<16x32xf32>
    %c1_110 = arith.constant 1 : index
    %c0_111 = arith.constant 0 : index
    %c0_112 = arith.constant 0 : index
    %285 = vector.load %arg6[%c1_110, %c0_111, %c0_112] : memref<2x32x32xf32, #tpu.memory_space<vmem>>, vector<1x32x32xf32>
    %286 = vector.shape_cast %285 : vector<1x32x32xf32> to vector<32x32xf32>
    %cst_113 = arith.constant dense<0.000000e+00> : vector<16x32xf32>
    %287 = tpu.matmul %284, %286, %cst_113 {dimension_numbers = #tpu.dot_dimension_numbers<[1], [0], [0], [1], [0, 0, 1, 1], [], []>} : vector<16x32xf32>, vector<32x32xf32>, vector<16x32xf32> -> vector<16x32xf32>
    %c1_114 = arith.constant 1 : index
    %c0_115 = arith.constant 0 : index
    %c0_116 = arith.constant 0 : index
    %288 = vector.load %arg7[%c1_114, %c0_115, %c0_116] : memref<2x1x32xf32, #tpu.memory_space<vmem>>, vector<1x1x32xf32>
    %289 = vector.shape_cast %288 : vector<1x1x32xf32> to vector<1x32xf32>
    %290 = vector.broadcast %289 : vector<1x32xf32> to vector<16x32xf32>
    %291 = arith.addf %287, %290 : vector<16x32xf32>
    %292 = arith.addf %291, %193 : vector<16x32xf32>
    %c1_117 = arith.constant 1 : index
    %c0_118 = arith.constant 0 : index
    %c0_119 = arith.constant 0 : index
    %293 = vector.load %arg8[%c1_117, %c0_118, %c0_119] : memref<2x1x32xf32, #tpu.memory_space<vmem>>, vector<1x1x32xf32>
    %294 = vector.shape_cast %293 : vector<1x1x32xf32> to vector<1x32xf32>
    %c1_120 = arith.constant 1 : index
    %c0_121 = arith.constant 0 : index
    %c0_122 = arith.constant 0 : index
    %295 = vector.load %arg9[%c1_120, %c0_121, %c0_122] : memref<2x1x32xf32, #tpu.memory_space<vmem>>, vector<1x1x32xf32>
    %296 = vector.shape_cast %295 : vector<1x1x32xf32> to vector<1x32xf32>
    %cst_123 = arith.constant dense<0.000000e+00> : vector<16xf32>
    %297 = vector.multi_reduction <add>, %292, %cst_123 [1] : vector<16x32xf32> to vector<16xf32>
    %298 = vector.shape_cast %297 : vector<16xf32> to vector<16x1xf32>
    %cst_124 = arith.constant 3.200000e+01 : f32
    %299 = vector.broadcast %cst_124 : f32 to vector<16x1xf32>
    %300 = arith.divf %298, %299 : vector<16x1xf32>
    %301 = vector.broadcast %300 : vector<16x1xf32> to vector<16x32xf32>
    %302 = arith.subf %292, %301 : vector<16x32xf32>
    %303 = arith.mulf %302, %302 : vector<16x32xf32>
    %cst_125 = arith.constant dense<0.000000e+00> : vector<16xf32>
    %304 = vector.multi_reduction <add>, %303, %cst_125 [1] : vector<16x32xf32> to vector<16xf32>
    %305 = vector.shape_cast %304 : vector<16xf32> to vector<16x1xf32>
    %cst_126 = arith.constant 3.200000e+01 : f32
    %306 = vector.broadcast %cst_126 : f32 to vector<16x1xf32>
    %307 = arith.divf %305, %306 : vector<16x1xf32>
    %cst_127 = arith.constant 9.99999996E-13 : f32
    %308 = vector.broadcast %cst_127 : f32 to vector<16x1xf32>
    %309 = arith.addf %307, %308 : vector<16x1xf32>
    %310 = math.rsqrt %309 : vector<16x1xf32>
    %311 = vector.broadcast %310 : vector<16x1xf32> to vector<16x32xf32>
    %312 = arith.mulf %302, %311 : vector<16x32xf32>
    %313 = vector.broadcast %294 : vector<1x32xf32> to vector<16x32xf32>
    %314 = arith.mulf %312, %313 : vector<16x32xf32>
    %315 = vector.broadcast %296 : vector<1x32xf32> to vector<16x32xf32>
    %316 = arith.addf %314, %315 : vector<16x32xf32>
    %c1_128 = arith.constant 1 : index
    %c0_129 = arith.constant 0 : index
    %c0_130 = arith.constant 0 : index
    %317 = vector.load %arg10[%c1_128, %c0_129, %c0_130] : memref<2x32x64xf32, #tpu.memory_space<vmem>>, vector<1x32x64xf32>
    %318 = vector.shape_cast %317 : vector<1x32x64xf32> to vector<32x64xf32>
    %cst_131 = arith.constant dense<0.000000e+00> : vector<16x64xf32>
    %319 = tpu.matmul %316, %318, %cst_131 {dimension_numbers = #tpu.dot_dimension_numbers<[1], [0], [0], [1], [0, 0, 1, 1], [], []>} : vector<16x32xf32>, vector<32x64xf32>, vector<16x64xf32> -> vector<16x64xf32>
    %c1_132 = arith.constant 1 : index
    %c0_133 = arith.constant 0 : index
    %c0_134 = arith.constant 0 : index
    %320 = vector.load %arg11[%c1_132, %c0_133, %c0_134] : memref<2x1x64xf32, #tpu.memory_space<vmem>>, vector<1x1x64xf32>
    %321 = vector.shape_cast %320 : vector<1x1x64xf32> to vector<1x64xf32>
    %322 = vector.broadcast %321 : vector<1x64xf32> to vector<16x64xf32>
    %323 = arith.addf %319, %322 : vector<16x64xf32>
    %cst_135 = arith.constant 5.000000e-01 : f32
    %324 = vector.broadcast %cst_135 : f32 to vector<16x64xf32>
    %325 = arith.mulf %324, %323 : vector<16x64xf32>
    %cst_136 = arith.constant 0.707106769 : f32
    %326 = vector.broadcast %cst_136 : f32 to vector<16x64xf32>
    %327 = arith.mulf %323, %326 : vector<16x64xf32>
    %328 = math.erf %327 : vector<16x64xf32>
    %cst_137 = arith.constant 1.000000e+00 : f32
    %329 = vector.broadcast %cst_137 : f32 to vector<16x64xf32>
    %330 = arith.addf %329, %328 : vector<16x64xf32>
    %331 = arith.mulf %325, %330 : vector<16x64xf32>
    %c1_138 = arith.constant 1 : index
    %c0_139 = arith.constant 0 : index
    %c0_140 = arith.constant 0 : index
    %332 = vector.load %arg12[%c1_138, %c0_139, %c0_140] : memref<2x64x32xf32, #tpu.memory_space<vmem>>, vector<1x64x32xf32>
    %333 = vector.shape_cast %332 : vector<1x64x32xf32> to vector<64x32xf32>
    %cst_141 = arith.constant dense<0.000000e+00> : vector<16x32xf32>
    %334 = tpu.matmul %331, %333, %cst_141 {dimension_numbers = #tpu.dot_dimension_numbers<[1], [0], [0], [1], [0, 0, 1, 1], [], []>} : vector<16x64xf32>, vector<64x32xf32>, vector<16x32xf32> -> vector<16x32xf32>
    %c1_142 = arith.constant 1 : index
    %c0_143 = arith.constant 0 : index
    %c0_144 = arith.constant 0 : index
    %335 = vector.load %arg13[%c1_142, %c0_143, %c0_144] : memref<2x1x32xf32, #tpu.memory_space<vmem>>, vector<1x1x32xf32>
    %336 = vector.shape_cast %335 : vector<1x1x32xf32> to vector<1x32xf32>
    %337 = vector.broadcast %336 : vector<1x32xf32> to vector<16x32xf32>
    %338 = arith.addf %334, %337 : vector<16x32xf32>
    %339 = arith.addf %338, %316 : vector<16x32xf32>
    %c1_145 = arith.constant 1 : index
    %c0_146 = arith.constant 0 : index
    %c0_147 = arith.constant 0 : index
    %340 = vector.load %arg14[%c1_145, %c0_146, %c0_147] : memref<2x1x32xf32, #tpu.memory_space<vmem>>, vector<1x1x32xf32>
    %341 = vector.shape_cast %340 : vector<1x1x32xf32> to vector<1x32xf32>
    %c1_148 = arith.constant 1 : index
    %c0_149 = arith.constant 0 : index
    %c0_150 = arith.constant 0 : index
    %342 = vector.load %arg15[%c1_148, %c0_149, %c0_150] : memref<2x1x32xf32, #tpu.memory_space<vmem>>, vector<1x1x32xf32>
    %343 = vector.shape_cast %342 : vector<1x1x32xf32> to vector<1x32xf32>
    %cst_151 = arith.constant dense<0.000000e+00> : vector<16xf32>
    %344 = vector.multi_reduction <add>, %339, %cst_151 [1] : vector<16x32xf32> to vector<16xf32>
    %345 = vector.shape_cast %344 : vector<16xf32> to vector<16x1xf32>
    %cst_152 = arith.constant 3.200000e+01 : f32
    %346 = vector.broadcast %cst_152 : f32 to vector<16x1xf32>
    %347 = arith.divf %345, %346 : vector<16x1xf32>
    %348 = vector.broadcast %347 : vector<16x1xf32> to vector<16x32xf32>
    %349 = arith.subf %339, %348 : vector<16x32xf32>
    %350 = arith.mulf %349, %349 : vector<16x32xf32>
    %cst_153 = arith.constant dense<0.000000e+00> : vector<16xf32>
    %351 = vector.multi_reduction <add>, %350, %cst_153 [1] : vector<16x32xf32> to vector<16xf32>
    %352 = vector.shape_cast %351 : vector<16xf32> to vector<16x1xf32>
    %cst_154 = arith.constant 3.200000e+01 : f32
    %353 = vector.broadcast %cst_154 : f32 to vector<16x1xf32>
    %354 = arith.divf %352, %353 : vector<16x1xf32>
    %cst_155 = arith.constant 9.99999996E-13 : f32
    %355 = vector.broadcast %cst_155 : f32 to vector<16x1xf32>
    %356 = arith.addf %354, %355 : vector<16x1xf32>
    %357 = math.rsqrt %356 : vector<16x1xf32>
    %358 = vector.broadcast %357 : vector<16x1xf32> to vector<16x32xf32>
    %359 = arith.mulf %349, %358 : vector<16x32xf32>
    %360 = vector.broadcast %341 : vector<1x32xf32> to vector<16x32xf32>
    %361 = arith.mulf %359, %360 : vector<16x32xf32>
    %362 = vector.broadcast %343 : vector<1x32xf32> to vector<16x32xf32>
    %363 = arith.addf %361, %362 : vector<16x32xf32>
    %364 = vector.extract_strided_slice %363 {offsets = [0, 0], sizes = [1, 32], strides = [1, 1]} : vector<16x32xf32> to vector<1x32xf32>
    %365 = vector.extract_strided_slice %363 {offsets = [8, 0], sizes = [1, 32], strides = [1, 1]} : vector<16x32xf32> to vector<1x32xf32>
    %366 = tpu.concatenate %364, %365 in 0 : vector<1x32xf32>, vector<1x32xf32> -> vector<2x32xf32>
    %c0_156 = arith.constant 0 : index
    %c0_157 = arith.constant 0 : index
    %367 = vector.load %arg16[%c0_156, %c0_157] : memref<32x32xf32, #tpu.memory_space<vmem>>, vector<32x32xf32>
    %cst_158 = arith.constant dense<0.000000e+00> : vector<2x32xf32>
    %368 = tpu.matmul %366, %367, %cst_158 {dimension_numbers = #tpu.dot_dimension_numbers<[1], [0], [0], [1], [0, 0, 1, 1], [], []>} : vector<2x32xf32>, vector<32x32xf32>, vector<2x32xf32> -> vector<2x32xf32>
    %c0_159 = arith.constant 0 : index
    %c0_160 = arith.constant 0 : index
    %369 = vector.load %arg17[%c0_159, %c0_160] : memref<1x32xf32, #tpu.memory_space<vmem>>, vector<1x32xf32>
    %370 = vector.broadcast %369 : vector<1x32xf32> to vector<2x32xf32>
    %371 = arith.addf %368, %370 : vector<2x32xf32>
    %372 = math.tanh %371 : vector<2x32xf32>
    %c0_161 = arith.constant 0 : index
    %c0_162 = arith.constant 0 : index
    %373 = vector.load %arg18[%c0_161, %c0_162] : memref<32x128xf32, #tpu.memory_space<vmem>>, vector<32x128xf32>
    %cst_163 = arith.constant dense<0.000000e+00> : vector<2x128xf32>
    %374 = tpu.matmul %372, %373, %cst_163 {dimension_numbers = #tpu.dot_dimension_numbers<[1], [0], [0], [1], [0, 0, 1, 1], [], []>} : vector<2x32xf32>, vector<32x128xf32>, vector<2x128xf32> -> vector<2x128xf32>
    %c0_164 = arith.constant 0 : index
    %c0_165 = arith.constant 0 : index
    %375 = vector.load %arg19[%c0_164, %c0_165] : memref<1x128xf32, #tpu.memory_space<vmem>>, vector<1x128xf32>
    %376 = vector.broadcast %375 : vector<1x128xf32> to vector<2x128xf32>
    %377 = arith.addf %374, %376 : vector<2x128xf32>
    %c0_166 = arith.constant 0 : index
    %c0_167 = arith.constant 0 : index
    %378 = vector.load %arg20[%c0_166, %c0_167] : memref<2x128xf32, #tpu.memory_space<vmem>>, vector<2x128xf32>
    tpu.vector_store %arg20[%c0_166, %c0_167], %377 {strides = array<i32>} : memref<2x128xf32, #tpu.memory_space<vmem>>, vector<2x128xf32>,
    return
  }
}

</mosaic_0001>

<bundles_post_ra>
// kernel: fine_tune_protein_bert_forward.1
= control target key start
LH: loop header
LB: loop body
LE: loop exit
PB: predicated region body
PF: predicated region fallthrough
CT: control target
= control target key end

     0   :  { %s3767_s0 = inlined_call_operand.vmem [shape: f32[16,32], index: 0, kind: input, shape index: {}]   ;;  %s3768_s1 = inlined_call_operand.vmem [shape: f32[2,8], index: 1, kind: input, shape index: {}]   ;;  %s3769_s2 = inlined_call_operand.vmem [shape: f32[1,32], index: 2, kind: input, shape index: {}]   ;;  %s3770_s3 = inlined_call_operand.vmem [shape: f32[1,32], index: 3, kind: input, shape index: {}]   ;;  %s3771_s4 = inlined_call_operand.vmem [shape: f32[2,32,96], index: 4, kind: input, shape index: {}]   ;;  %s3772_s5 = inlined_call_operand.vmem [shape: f32[2,1,96], index: 5, kind: input, shape index: {}]   ;;  %s3773_s6 = inlined_call_operand.vmem [shape: f32[2,32,32], index: 6, kind: input, shape index: {}]   ;;  %s3774_s7 = inlined_call_operand.vmem [shape: f32[2,1,32], index: 7, kind: input, shape index: {}]   ;;  %s3775_s8 = inlined_call_operand.vmem [shape: f32[2,1,32], index: 8, kind: input, shape index: {}]   ;;  %s3776_s9 = inlined_call_operand.vmem [shape: f32[2,1,32], index: 9, kind: input, shape index: {}]   ;;  %s3777_s10 = inlined_call_operand.vmem [shape: f32[2,32,64], index: 10, kind: input, shape index: {}]   ;;  %s3778_s11 = inlined_call_operand.vmem [shape: f32[2,1,64], index: 11, kind: input, shape index: {}]   ;;  %s3779_s12 = inlined_call_operand.vmem [shape: f32[2,64,32], index: 12, kind: input, shape index: {}]   ;;  %s3780_s13 = inlined_call_operand.vmem [shape: f32[2,1,32], index: 13, kind: input, shape index: {}]   ;;  %s3781_s14 = inlined_call_operand.vmem [shape: f32[2,1,32], index: 14, kind: input, shape index: {}]   ;;  %s3782_s15 = inlined_call_operand.vmem [shape: f32[2,1,32], index: 15, kind: input, shape index: {}]   ;;  %s3783_s16 = inlined_call_operand.vmem [shape: f32[32,32], index: 16, kind: input, shape index: {}]   ;;  %s3784_s17 = inlined_call_operand.vmem [shape: f32[1,32], index: 17, kind: input, shape index: {}]   ;;  %s3785_s18 = inlined_call_operand.vmem [shape: f32[32,128], index: 18, kind: input, shape index: {}]   ;;  %s3786_s19 = inlined_call_operand.vmem [shape: f32[1,128], index: 19, kind: input, shape index: {}]   ;;  %s3787_s20 = inlined_call_operand.hbm [shape: f32[2,128], index: 20, kind: output, shape index: {}]  }
   0x1   :  { %3790 = sst [smem:[#allocation5_spill]] %s3767_s0 }
   0x2   :  { %3791 = sst [smem:[#allocation6_spill]] %s3768_s1 }
   0x3   :  { %3792 = sst [smem:[#allocation7_spill]] %s3769_s2 }
   0x4   :  { %3793 = sst [smem:[#allocation8_spill]] %s3770_s3 }
   0x5   :  { %3794 = sst [smem:[#allocation9_spill]] %s3771_s4 }
   0x6   :  { %s3795_s23 = sld [smem:[#allocation5_spill]]  ;;  %vm70_vm0 = vcmask 261120  }
   0xc   :  { %v66_v0 = vld [vmem:[%s3795_s23] sm:$0xff]  ;;  %v67_v1 = vld [vmem:[%s3795_s23 + $0x8] sm:$0xff] }
   0xd   :  { %25 = vsyncpa [#allocation3], 0  ;;  %v71_v2 = vsel %vm70_vm0, %v66_v0, 0.0  ;;  %v74_v3 = vsel %vm70_vm0, %v67_v1, 0.0  ;;  %s3796_s26 = sld [smem:[#allocation9_spill]]  ;;  %s3797_s22 = sld [smem:[#allocation7_spill]]  ;;  %v286_v48 = vlaneseq }
   0xe   :  { %72 = vadd.xlane.f32.xlu0 %v71_v2  ;;  %s3798_s2 = sld [smem:[#allocation8_spill]]  ;;  %v3209_v36 = vmov 0.0   ;;  %vm3210_vm1 = vmmov 0   ;;  %v2629_v37 = vld [vmem:[%s3772_s5] ss:$0 sm:$0xff]  ;;  %s3211_s27 = smov 80  }
   0xf   :  { %2826 = vmatprep.subr.mxu1 %v3209_v36  ;;  %2828 = vmatprep.mubr.msk.f32.mxu1 %vm3210_vm1, %v3209_v36  ;;  %s3212_s28 = smov 96   ;;  %s3213_s4 = smov 112   ;;  %vm210_vm2 = vcmask 130048   ;;  %v287_v49 = vshrl.u32 %v286_v48, 7  ;;  %vm291_vm3 = vcmask 64512   ;;  %vm1148_vm4 = vcmask 523264  }
  0x10   :  { %s3799_s0 = sld [smem:[#allocation6_spill]]  ;;  %s3214_s21 = smov 48   ;;  %vm2441_vm5 = vcmask 1040384  }
  0x11   :  { %v288_v50 = vsub.s32 0, %v287_v49  ;;  %v631_v60 = vsub.s32 1, %v287_v49  ;;  %s3215_s1 = smov 64  }
  0x12   :  { %75 = vadd.xlane.f32.xlu0 %v74_v3 }
  0x13   :  { %v115_v14 = vld [vmem:[%s3796_s26] sm:$0xff]  ;;  %v116_v15 = vld [vmem:[%s3796_s26 + $0x8] sm:$0xff]  ;;  %v117_v16 = vld [vmem:[%s3796_s26 + $0x10] sm:$0xff] }
  0x14   :  { %v3021_v17 = vpack.c.bf16 %v116_v15, %v115_v14  ;;  %v118_v18 = vld [vmem:[%s3796_s26 + $0x18] sm:$0xff]  ;;  %v2627_v27 = vld [vmem:[%s3797_s22] ss:$0 sm:$0xff] }
  0x15   :  { %v3025_v19 = vpack.c.bf16 %v118_v18, %v117_v16  ;;  %v2628_v29 = vld [vmem:[%s3798_s2] ss:$0 sm:$0xff] }
  0x16   :  { %3022 = vmatprep.subr.bf16.mxu0 %v3021_v17  ;;  %v114_v51 = vld [vmem:[%s3799_s0] sm:$0x3]  ;;  %s3216_s0 = smov 16  }
  0x17   :  { %3024 = vmatpush3.bf16.msra.mxu0 %v3021_v17  ;;  %v3407_v52 = vrot.slane %v114_v51, %v288_v50  ;;  %v893_v50 = vld [vmem:[%s3773_s6] sm:$0xff] }
  0x18   :  { %3026 = vmatprep.subr.bf16.mxu0 %v3025_v19 }
  0x1b   :  { %3028 = vmatpush3.bf16.msra.mxu0 %v3025_v19 }
  0x1c   :  { %2836 = vmatprep.subr.mxu0 %v3209_v36 }
  0x9b   :  { %v73_v4 = vpop.xlane.xlu0 %72 }
  0x9c   :  { %v78_v5 = vmul.f32 0.03125, %v73_v4 }
  0x9e   :  { %v80_v6 = vsub.f32 %v66_v0, %v78_v5  ;;  %v3413_v0 = vrot.slane %v114_v51, %v631_v60  ;;  %v894_v51 = vld [vmem:[%s3773_s6 + $0x8] sm:$0xff] }
  0x9f   :  { %v76_v7 = vpop.xlane.xlu0 %75 }
  0xa0   :  { %v79_v8 = vmul.f32 0.03125, %v76_v7  ;;  %v82_v9 = vmul.f32 %v80_v6, %v80_v6 }
  0xa2   :  { %v81_v10 = vsub.f32 %v67_v1, %v79_v8  ;;  %v84_v11 = vsel %vm70_vm0, %v82_v9, 0.0 }
  0xa3   :  { %85 = vadd.xlane.f32.xlu1 %v84_v11 }
  0xa4   :  { %v83_v12 = vmul.f32 %v81_v10, %v81_v10 }
  0xa6   :  { %v87_v13 = vsel %vm70_vm0, %v83_v12, 0.0 }
  0xa7   :  { %88 = vadd.xlane.f32.xlu1 %v87_v13 }
 0x130   :  { %v86_v20 = vpop.xlane.xlu1 %85 }
 0x131   :  { %v90_v21 = vmul.f32 0.03125, %v86_v20 }
 0x133   :  { %v92_v22 = vadd.f32 1e-12, %v90_v21 }
 0x134   :  { %v89_v23 = vpop.xlane.xlu1 %88 }
 0x135   :  { %3123 = vrsqrt.f32 %v92_v22  ;;  %v91_v24 = vmul.f32 0.03125, %v89_v23 }
 0x137   :  { %v93_v25 = vadd.f32 1e-12, %v91_v24 }
 0x139   :  { %3125 = vrsqrt.f32 %v93_v25 }
 0x13f   :  { %v3124_v26 = vpop.eup %3123 }
 0x140   :  { %v96_v28 = vmul.f32 %v3124_v26, %v80_v6 }
 0x142   :  { %v104_v30 = vmul.f32 %v2627_v27, %v96_v28 }
 0x143   :  { %v3126_v31 = vpop.eup %3125 }
 0x144   :  { %v97_v32 = vmul.f32 %v3126_v31, %v81_v10  ;;  %v3352_v33 = vadd.f32 %v2628_v29, %v104_v30 }
 0x146   :  { %v105_v34 = vmul.f32 %v2627_v27, %v97_v32  ;;  %2823 = vmatprep.mubr.msk.f32.mxu0 %vm70_vm0, %v3352_v33 }
 0x148   :  { %v3356_v35 = vadd.f32 %v2628_v29, %v105_v34 }
 0x14a   :  { %2824 = vmatmul.mubr.msk.f32.vlgmr.msra.gmra.mrb[0].mxu0 %vm70_vm0, %v3356_v35 }
 0x14b   :  { %2838 = vmatprep.mubr.msk.f32.mxu0 %vm3210_vm1, %v3209_v36 }
 0x21d   :  { %v2825_v38 = vpop.f32.mrb[0].mxu0 }
 0x21e   :  { %v198_v39 = vpop.f32.mrb[1].mxu0  ;;  %v3375_v41 = vadd.f32 %v2825_v38, %v2629_v37 }
 0x21f   :  { %v3369_v40 = vadd.f32 %v2629_v37, %v198_v39 }
 0x221   :  { %381 = vrot.lane.b32.xlu1 %v3369_v40, %s3211_s27  ;;  %208 = vrot.lane.b32.xlu0 %v3369_v40, %s3212_s28 }
 0x225   :  { %379 = vrot.lane.b32.xlu1 %v3369_v40, %s3213_s4  ;;  %723 = vrot.lane.b32.xlu0 %v3375_v41, %s3211_s27 }
 0x229   :  { %552 = vrot.lane.b32.xlu1 %v3375_v41, %s3212_s28 }
 0x22d   :  { %721 = vrot.lane.b32.xlu1 %v3375_v41, %s3213_s4 }
 0x293   :  { %v382_v42 = vpop.permute.xlu1 %381  ;;  %v209_v43 = vpop.permute.xlu0 %208 }
 0x294   :  { %2827 = vmatpush3.xpose.msk.msra.mxu1 %vm210_vm2, %v209_v43  ;;  %2837 = vmatpush3.xpose.msk.msra.mxu0 %vm210_vm2, %v382_v42 }
 0x295   :  { %2846 = vmatprep.subr.mxu0 %v3209_v36  ;;  %2831 = vmatprep.subr.mxu1 %v3209_v36 }
 0x297   :  { %v380_v44 = vpop.permute.xlu1 %379  ;;  %2829 = vmatmul.mubr.msk.f32.vlgmr.msra.gmra.mrb[0].mxu1 %vm210_vm2, %v3369_v40  ;;  %v724_v46 = vpop.permute.xlu0 %723 }
 0x298   :  { %2839 = vmatmul.mubr.msk.f32.vlgmr.msra.gmra.mrb[2].mxu0 %vm210_vm2, %v380_v44  ;;  %2833 = vmatprep.mubr.msk.f32.mxu1 %vm3210_vm1, %v3209_v36 }
 0x299   :  { %2848 = vmatprep.mubr.msk.f32.mxu0 %vm3210_vm1, %v3209_v36 }
 0x29b   :  { %v553_v45 = vpop.permute.xlu1 %552 }
 0x29c   :  { %2847 = vmatpush3.xpose.msk.msra.mxu0 %vm210_vm2, %v553_v45 }
 0x29d   :  { %2856 = vmatprep.subr.mxu0 %v3209_v36 }
 0x29f   :  { %2849 = vmatmul.mubr.msk.f32.vlgmr.msra.gmra.mrb[4].mxu0 %vm210_vm2, %v3375_v41  ;;  %v722_v47 = vpop.permute.xlu1 %721 }
 0x2a0   :  { %2857 = vmatpush3.xpose.msk.msra.mxu0 %vm210_vm2, %v724_v46  ;;  %2858 = vmatprep.mubr.msk.f32.mxu0 %vm3210_vm1, %v3209_v36 }
 0x2a3   :  { %2859 = vmatmul.mubr.msk.f32.vlgmr.msra.gmra.mrb[6].mxu0 %vm210_vm2, %v722_v47 }
 0x36a   :  { %v281_v53 = vpop.f32.mrb[0].mxu1 }
 0x36b   :  { %v285_v54 = vmul.f32 0.25, %v281_v53  ;;  %v2830_v55 = vpop.f32.mrb[1].mxu1  ;;  %v453_v56 = vpop.f32.mrb[2].mxu0  ;;  %v895_v53 = vld [vmem:[%s3773_s6 + $0x10] sm:$0xff] }
 0x36c   :  { %v457_v57 = vmul.f32 0.25, %v453_v56  ;;  %v2840_v58 = vpop.f32.mrb[3].mxu0  ;;  %v896_v55 = vld [vmem:[%s3773_s6 + $0x18] sm:$0xff] }
 0x36d   :  { %v290_v59 = vadd.f32 %v3407_v52, %v285_v54  ;;  %v3029_v54 = vpack.c.bf16 %v894_v51, %v893_v50  ;;  %v3033_v56 = vpack.c.bf16 %v896_v55, %v895_v53  ;;  %v1135_v51 = vld [vmem:[%s3779_s12 + $0x10] sm:$0xff]  ;;  %v1136_v53 = vld [vmem:[%s3779_s12 + $0x18] sm:$0xff]  ;;  %v1137_v55 = vld [vmem:[%s3779_s12 + $0x20] sm:$0xff] }
 0x36e   :  { %v458_v61 = vadd.f32 %v457_v57, %v3407_v52 }
 0x36f   :  { %v292_v62 = vsel %vm291_vm3, %v290_v59, -inf  ;;  %3030 = vmatprep.subr.bf16.mxu0 %v3029_v54 }
 0x370   :  { %293 = vmax.xlane.f32.xlu0 %v292_v62  ;;  %v459_v63 = vsel %vm291_vm3, %v458_v61, -inf  ;;  %3032 = vmatpush3.bf16.msra.mxu0 %v3029_v54  ;;  %v3049_v54 = vpack.c.bf16 %v1136_v53, %v1135_v51 }
 0x371   :  { %460 = vmax.xlane.f32.xlu1 %v459_v63  ;;  %3034 = vmatprep.subr.bf16.mxu0 %v3033_v56 }
 0x372   :  { %v624_v1 = vpop.f32.mrb[4].mxu0 }
 0x373   :  { %v628_v2 = vmul.f32 0.25, %v624_v1  ;;  %v2850_v3 = vpop.f32.mrb[5].mxu0 }
 0x374   :  { %3036 = vmatpush3.bf16.msra.mxu0 %v3033_v56  ;;  %v1138_v56 = vld [vmem:[%s3779_s12 + $0x28] sm:$0xff] }
 0x375   :  { %v633_v4 = vadd.f32 %v3413_v0, %v628_v2 }
 0x376   :  { %v795_v5 = vpop.f32.mrb[6].mxu0 }
 0x377   :  { %v799_v6 = vmul.f32 0.25, %v795_v5  ;;  %v2860_v7 = vpop.f32.mrb[7].mxu0  ;;  %v634_v8 = vsel %vm291_vm3, %v633_v4, -inf }
 0x378   :  { %635 = vmax.xlane.f32.xlu0 %v634_v8 }
 0x379   :  { %v800_v9 = vadd.f32 %v799_v6, %v3413_v0  ;;  %v2644_v6 = vld [vmem:[%s3774_s7] ss:$0 sm:$0xff] }
 0x37b   :  { %v801_v10 = vsel %vm291_vm3, %v800_v9, -inf }
 0x37c   :  { %802 = vmax.xlane.f32.xlu0 %v801_v10 }
 0x3fd   :  { %v294_v11 = vpop.xlane.xlu0 %293 }
 0x3fe   :  { %v295_v12 = vsub.f32 %v290_v59, %v294_v11  ;;  %v461_v13 = vpop.xlane.xlu1 %460 }
 0x3ff   :  { %v462_v14 = vsub.f32 %v458_v61, %v461_v13 }
 0x400   :  { %v296_v15 = vmul.f32 1.442695, %v295_v12 }
 0x401   :  { %v463_v16 = vmul.f32 1.442695, %v462_v14 }
 0x402   :  { %3127 = vpow2.f32 %v296_v15 }
 0x403   :  { %3129 = vpow2.f32 %v463_v16 }
 0x405   :  { %v636_v17 = vpop.xlane.xlu0 %635 }
 0x406   :  { %v637_v18 = vsub.f32 %v633_v4, %v636_v17 }
 0x408   :  { %v638_v19 = vmul.f32 1.442695, %v637_v18 }
 0x409   :  { %v803_v26 = vpop.xlane.xlu0 %802 }
 0x40a   :  { %3131 = vpow2.f32 %v638_v19  ;;  %v804_v27 = vsub.f32 %v800_v9, %v803_v26  ;;  %v1033_v26 = vld [vmem:[%s3777_s10 + $0x10] sm:$0xff] }
 0x40c   :  { %v3128_v20 = vpop.eup %3127  ;;  %v805_v28 = vmul.f32 1.442695, %v804_v27  ;;  %v1034_v27 = vld [vmem:[%s3777_s10 + $0x18] sm:$0xff] }
 0x40d   :  { %v3130_v21 = vpop.eup %3129  ;;  %v298_v22 = vsel %vm291_vm3, %v3128_v20, 0.0 }
 0x40e   :  { %299 = vadd.xlane.f32.xlu0 %v298_v22  ;;  %v465_v23 = vsel %vm291_vm3, %v3130_v21, 0.0  ;;  %3133 = vpow2.f32 %v805_v28  ;;  %v3041_v28 = vpack.c.bf16 %v1034_v27, %v1033_v26 }
 0x40f   :  { %466 = vadd.xlane.f32.xlu1 %v465_v23 }
 0x414   :  { %v3132_v24 = vpop.eup %3131 }
 0x415   :  { %v640_v25 = vsel %vm291_vm3, %v3132_v24, 0.0 }
 0x416   :  { %641 = vadd.xlane.f32.xlu0 %v640_v25 }
 0x418   :  { %v3134_v29 = vpop.eup %3133 }
 0x419   :  { %v807_v30 = vsel %vm291_vm3, %v3134_v29, 0.0 }
 0x420   :  { %470 = vrot.lane.b32.xlu1 %v3369_v40, %s3214_s21 }
 0x424   :  { %645 = vrot.lane.b32.xlu1 %v3375_v41, %s3215_s1 }
 0x42c   :  { %303 = vrot.lane.b32.xlu0 %v3369_v40, %s3215_s1 }
 0x448   :  { %808 = vadd.xlane.f32.xlu1 %v807_v30 }
 0x459   :  { %812 = vrot.lane.b32.xlu1 %v3375_v41, %s3214_s21 }
 0x49b   :  { %v300_v31 = vpop.xlane.xlu0 %299 }
 0x49c   :  { %3135 = vrcp.f32 %v300_v31  ;;  %v467_v32 = vpop.xlane.xlu1 %466 }
 0x49d   :  { %3137 = vrcp.f32 %v467_v32 }
 0x4a0   :  { %v471_v39 = vpop.permute.xlu1 %470 }
 0x4a3   :  { %v642_v34 = vpop.xlane.xlu0 %641 }
 0x4a4   :  { %3139 = vrcp.f32 %v642_v34  ;;  %v646_v43 = vpop.permute.xlu1 %645 }
 0x4a6   :  { %v3136_v37 = vpop.eup %3135 }
 0x4a7   :  { %v302_v38 = vmul.f32 %v3136_v37, %v3128_v20  ;;  %v304_v40 = vpop.permute.xlu0 %303  ;;  %v3138_v42 = vpop.eup %3137 }
 0x4a8   :  { %2832 = vmatpush3.msra.mxu1 %v304_v40  ;;  %v469_v41 = vmul.f32 %v3138_v42, %v3130_v21  ;;  %v2648_v42 = vld [vmem:[%s3776_s9] ss:$0 sm:$0xff] }
 0x4a9   :  { %2834 = vmatmul.mubr.msk.f32.vlgmr.msra.gmra.mrb[2].mxu1 %vm291_vm3, %v302_v38  ;;  %2841 = vmatprep.subr.mxu1 %v3209_v36 }
 0x4aa   :  { %2842 = vmatpush3.msra.mxu1 %v471_v39  ;;  %2843 = vmatprep.mubr.msk.f32.mxu1 %vm3210_vm1, %v3209_v36  ;;  %v2647_v39 = vld [vmem:[%s3775_s8] ss:$0 sm:$0xff] }
 0x4ab   :  { %2851 = vmatprep.subr.mxu1 %v3209_v36 }
 0x4ad   :  { %2844 = vmatmul.mubr.msk.f32.vlgmr.msra.gmra.mrb[4].mxu1 %vm291_vm3, %v469_v41 }
 0x4ae   :  { %v3140_v44 = vpop.eup %3139  ;;  %2852 = vmatpush3.msra.mxu1 %v646_v43  ;;  %2853 = vmatprep.mubr.msk.f32.mxu1 %vm3210_vm1, %v3209_v36 }
 0x4af   :  { %v644_v45 = vmul.f32 %v3140_v44, %v3132_v24  ;;  %2861 = vmatprep.subr.mxu1 %v3209_v36  ;;  %v1032_v24 = vld [vmem:[%s3777_s10 + $0x8] sm:$0xff] }
 0x4b1   :  { %2854 = vmatmul.mubr.msk.f32.vlgmr.msra.gmra.mrb[6].mxu1 %vm291_vm3, %v644_v45 }
 0x4b2   :  { %2863 = vmatprep.mubr.msk.f32.mxu1 %vm3210_vm1, %v3209_v36 }
 0x4d5   :  { %v809_v46 = vpop.xlane.xlu1 %808 }
 0x4d6   :  { %3141 = vrcp.f32 %v809_v46 }
 0x4d9   :  { %v813_v47 = vpop.permute.xlu1 %812 }
 0x4da   :  { %2862 = vmatpush3.msra.mxu1 %v813_v47 }
 0x4e0   :  { %v3142_v48 = vpop.eup %3141 }
 0x4e1   :  { %v811_v49 = vmul.f32 %v3142_v48, %v3134_v29  ;;  %v1133_v48 = vld [vmem:[%s3779_s12] sm:$0xff] }
 0x4e3   :  { %2864 = vmatmul.mubr.msk.f32.vlgmr.msra.gmra.mrb[8].mxu1 %vm291_vm3, %v811_v49  ;;  %v1134_v49 = vld [vmem:[%s3779_s12 + $0x8] sm:$0xff] }
 0x4e4   :  { %v3045_v50 = vpack.c.bf16 %v1134_v49, %v1133_v48 }
 0x4e6   :  { %3046 = vmatprep.subr.bf16.mxu0 %v3045_v50 }
 0x57c   :  { %v375_v57 = vpop.f32.mrb[2].mxu1 }
 0x57d   :  { %v2835_v58 = vpop.f32.mrb[3].mxu1 }
 0x57e   :  { %v1139_v58 = vld [vmem:[%s3779_s12 + $0x30] sm:$0xff] }
 0x580   :  { %v542_v59 = vpop.f32.mrb[4].mxu1 }
 0x581   :  { %547 = vrot.lane.b32.xlu0 %v542_v59, %s3216_s0  ;;  %v2845_v60 = vpop.f32.mrb[5].mxu1  ;;  %v1140_v59 = vld [vmem:[%s3779_s12 + $0x38] sm:$0xff] }
 0x582   :  { %v3057_v60 = vpack.c.bf16 %v1140_v59, %v1139_v58 }
 0x584   :  { %v717_v61 = vpop.f32.mrb[6].mxu1 }
 0x585   :  { %v2855_v62 = vpop.f32.mrb[7].mxu1 }
 0x5b6   :  { %v884_v63 = vpop.f32.mrb[8].mxu1 }
 0x5b7   :  { %889 = vrot.lane.b32.xlu1 %v884_v63, %s3216_s0  ;;  %v2865_v1 = vpop.f32.mrb[9].mxu1 }
 0x5f3   :  { %v548_v2 = vpop.permute.xlu0 %547 }
 0x5f4   :  { %v550_v3 = vsel %vm210_vm2, %v375_v57, %v548_v2  ;;  %v3053_v57 = vpack.c.bf16 %v1138_v56, %v1137_v55  ;;  %v2662_v56 = vld [vmem:[%s3772_s5 + $0x1] ss:$0 sm:$0xff] }
 0x5f5   :  { %2874 = vmatprep.mubr.msk.f32.mxu0 %vm70_vm0, %v550_v3 }
 0x629   :  { %v890_v4 = vpop.permute.xlu1 %889 }
 0x62a   :  { %v892_v5 = vsel %vm210_vm2, %v717_v61, %v890_v4  ;;  %v2649_v61 = vld [vmem:[%s3778_s11] ss:$0 sm:$0xff] }
 0x62b   :  { %2875 = vmatmul.mubr.msk.f32.vlgmr.msra.gmra.mrb[8].mxu0 %vm70_vm0, %v892_v5 }
 0x62c   :  { %3048 = vmatpush3.bf16.msra.mxu0 %v3045_v50  ;;  %v2656_v50 = vld [vmem:[%s3782_s15] ss:$0 sm:$0xff] }
 0x62d   :  { %3050 = vmatprep.subr.bf16.mxu0 %v3049_v54 }
 0x630   :  { %3052 = vmatpush3.bf16.msra.mxu0 %v3049_v54 }
 0x631   :  { %3054 = vmatprep.subr.bf16.mxu0 %v3053_v57 }
 0x634   :  { %3056 = vmatpush3.bf16.msra.mxu0 %v3053_v57 }
 0x635   :  { %3058 = vmatprep.subr.bf16.mxu0 %v3057_v60 }
 0x638   :  { %3060 = vmatpush3.bf16.msra.mxu0 %v3057_v60 }
 0x639   :  { %2928 = vmatprep.subr.mxu0 %v3209_v36 }
 0x6fe   :  { %v2876_v7 = vpop.f32.mrb[8].mxu0 }
 0x6ff   :  { %v982_v8 = vadd.f32 %v2876_v7, %v2644_v6  ;;  %v976_v9 = vpop.f32.mrb[9].mxu0 }
 0x700   :  { %v977_v10 = vadd.f32 %v2644_v6, %v976_v9 }
 0x701   :  { %v986_v11 = vadd.f32 %v982_v8, %v3356_v35 }
 0x702   :  { %v985_v12 = vadd.f32 %v977_v10, %v3352_v33  ;;  %v1031_v33 = vld [vmem:[%s3777_s10] sm:$0xff] }
 0x703   :  { %v992_v13 = vsel %vm70_vm0, %v986_v11, 0.0  ;;  %v3037_v25 = vpack.c.bf16 %v1032_v24, %v1031_v33 }
 0x704   :  { %993 = vadd.xlane.f32.xlu1 %v992_v13  ;;  %v989_v14 = vsel %vm70_vm0, %v985_v12, 0.0  ;;  %v2652_v13 = vld [vmem:[%s3780_s13] ss:$0 sm:$0xff] }
 0x705   :  { %990 = vadd.xlane.f32.xlu0 %v989_v14  ;;  %3038 = vmatprep.subr.bf16.mxu1 %v3037_v25 }
 0x706   :  { %3040 = vmatpush3.bf16.msra.mxu1 %v3037_v25 }
 0x707   :  { %3042 = vmatprep.subr.bf16.mxu1 %v3041_v28 }
 0x70a   :  { %3044 = vmatpush3.bf16.msra.mxu1 %v3041_v28 }
 0x791   :  { %v994_v15 = vpop.xlane.xlu1 %993 }
 0x792   :  { %v996_v16 = vmul.f32 0.03125, %v994_v15  ;;  %v991_v17 = vpop.xlane.xlu0 %990 }
 0x793   :  { %v995_v18 = vmul.f32 0.03125, %v991_v17 }
 0x794   :  { %v998_v19 = vsub.f32 %v986_v11, %v996_v16 }
 0x795   :  { %v997_v20 = vsub.f32 %v985_v12, %v995_v18 }
 0x796   :  { %v1000_v23 = vmul.f32 %v998_v19, %v998_v19 }
 0x797   :  { %v999_v21 = vmul.f32 %v997_v20, %v997_v20 }
 0x798   :  { %v1004_v35 = vsel %vm70_vm0, %v1000_v23, 0.0 }
 0x799   :  { %v1001_v22 = vsel %vm70_vm0, %v999_v21, 0.0 }
 0x79a   :  { %1002 = vadd.xlane.f32.xlu0 %v1001_v22 }
 0x79e   :  { %1005 = vadd.xlane.f32.xlu0 %v1004_v35 }
 0x827   :  { %v1003_v29 = vpop.xlane.xlu0 %1002 }
 0x828   :  { %v1007_v30 = vmul.f32 0.03125, %v1003_v29 }
 0x82a   :  { %v1009_v31 = vadd.f32 1e-12, %v1007_v30  ;;  %v2657_v30 = vld [vmem:[%s3796_s26 + $0x20] sm:$0xff] }
 0x82b   :  { %v1006_v32 = vpop.xlane.xlu0 %1005 }
 0x82c   :  { %3143 = vrsqrt.f32 %v1009_v31  ;;  %v1008_v34 = vmul.f32 0.03125, %v1006_v32  ;;  %v2658_v31 = vld [vmem:[%s3796_s26 + $0x28] sm:$0xff] }
 0x82d   :  { %v3061_v32 = vpack.c.bf16 %v2658_v31, %v2657_v30 }
 0x82e   :  { %v1010_v37 = vadd.f32 1e-12, %v1008_v34  ;;  %v2659_v34 = vld [vmem:[%s3796_s26 + $0x30] sm:$0xff] }
 0x82f   :  { %3062 = vmatprep.subr.bf16.mxu1 %v3061_v32 }
 0x830   :  { %3145 = vrsqrt.f32 %v1010_v37  ;;  %v2660_v37 = vld [vmem:[%s3796_s26 + $0x38] sm:$0xff] }
 0x836   :  { %v3144_v38 = vpop.eup %3143 }
 0x837   :  { %v1013_v40 = vmul.f32 %v3144_v38, %v997_v20  ;;  %v3065_v38 = vpack.c.bf16 %v2660_v37, %v2659_v34 }
 0x839   :  { %v1021_v41 = vmul.f32 %v2647_v39, %v1013_v40 }
 0x83a   :  { %v3146_v43 = vpop.eup %3145 }
 0x83b   :  { %v1014_v44 = vmul.f32 %v3146_v43, %v998_v19  ;;  %v1029_v45 = vadd.f32 %v2648_v42, %v1021_v41 }
 0x83d   :  { %v1022_v46 = vmul.f32 %v2647_v39, %v1014_v44  ;;  %2885 = vmatprep.mubr.msk.f32.mxu1 %vm70_vm0, %v1029_v45 }
 0x83f   :  { %v1030_v47 = vadd.f32 %v2648_v42, %v1022_v46  ;;  %v2655_v46 = vld [vmem:[%s3781_s14] ss:$0 sm:$0xff] }
 0x841   :  { %2886 = vmatmul.mubr.msk.f32.vlgmr.msra.gmra.mrb[10].mxu1 %vm70_vm0, %v1030_v47 }
 0x842   :  { %3064 = vmatpush3.bf16.msra.mxu1 %v3061_v32 }
 0x843   :  { %3066 = vmatprep.subr.bf16.mxu1 %v3065_v38 }
 0x846   :  { %3068 = vmatpush3.bf16.msra.mxu1 %v3065_v38 }
 0x847   :  { %2918 = vmatprep.subr.mxu1 %v3209_v36 }
 0x914   :  { %v2887_v62 = vpop.f32.mrb[10].mxu1 }
 0x915   :  { %v1120_v63 = vadd.f32 %v2887_v62, %v2649_v61  ;;  %v1114_v1 = vpop.f32.mrb[11].mxu1 }
 0x916   :  { %v1115_v2 = vadd.f32 %v2649_v61, %v1114_v1 }
 0x917   :  { %v1126_v3 = vmul.f32 0.70710677, %v1120_v63  ;;  %v1124_v10 = vmul.f32 0.5, %v1120_v63 }
 0x918   :  { %v1125_v4 = vmul.f32 0.70710677, %v1115_v2  ;;  %v1123_v8 = vmul.f32 0.5, %v1115_v2 }
 0x919   :  { %3147 = verf.f32 %v1126_v3 }
 0x91a   :  { %3149 = verf.f32 %v1125_v4 }
 0x923   :  { %v3148_v5 = vpop.eup %3147 }
 0x924   :  { %v3150_v6 = vpop.eup %3149  ;;  %v1130_v7 = vadd.f32 1.0, %v3148_v5 }
 0x925   :  { %v1129_v9 = vadd.f32 1.0, %v3150_v6 }
 0x926   :  { %v1132_v12 = vmul.f32 %v1130_v7, %v1124_v10 }
 0x927   :  { %v1131_v11 = vmul.f32 %v1129_v9, %v1123_v8 }
 0x929   :  { %2904 = vmatprep.mubr.msk.f32.mxu0 %vm1148_vm4, %v1131_v11 }
 0x92a   :  { %2905 = vmatmul.mubr.msk.f32.vlgmr.msra.gmra.mrb[10].mxu0 %vm1148_vm4, %v1132_v12 }
 0x92b   :  { %2930 = vmatprep.mubr.msk.f32.mxu0 %vm3210_vm1, %v3209_v36 }
 0x9fd   :  { %v2906_v14 = vpop.f32.mrb[10].mxu0 }
 0x9fe   :  { %v1227_v15 = vadd.f32 %v2906_v14, %v2652_v13  ;;  %v1221_v16 = vpop.f32.mrb[11].mxu0 }
 0x9ff   :  { %v1222_v17 = vadd.f32 %v2652_v13, %v1221_v16 }
 0xa00   :  { %v1231_v18 = vadd.f32 %v1227_v15, %v1030_v47 }
 0xa01   :  { %v1230_v19 = vadd.f32 %v1222_v17, %v1029_v45 }
 0xa02   :  { %v1237_v20 = vsel %vm70_vm0, %v1231_v18, 0.0 }
 0xa03   :  { %1238 = vadd.xlane.f32.xlu1 %v1237_v20  ;;  %v1234_v21 = vsel %vm70_vm0, %v1230_v19, 0.0 }
 0xa04   :  { %1235 = vadd.xlane.f32.xlu0 %v1234_v21 }
 0xa90   :  { %v1239_v22 = vpop.xlane.xlu1 %1238 }
 0xa91   :  { %v1241_v23 = vmul.f32 0.03125, %v1239_v22  ;;  %v1236_v35 = vpop.xlane.xlu0 %1235 }
 0xa92   :  { %v1240_v33 = vmul.f32 0.03125, %v1236_v35 }
 0xa93   :  { %v1243_v24 = vsub.f32 %v1231_v18, %v1241_v23 }
 0xa94   :  { %v1242_v25 = vsub.f32 %v1230_v19, %v1240_v33 }
 0xa95   :  { %v1245_v26 = vmul.f32 %v1243_v24, %v1243_v24 }
 0xa96   :  { %v1244_v27 = vmul.f32 %v1242_v25, %v1242_v25 }
 0xa97   :  { %v1249_v28 = vsel %vm70_vm0, %v1245_v26, 0.0 }
 0xa98   :  { %1250 = vadd.xlane.f32.xlu1 %v1249_v28  ;;  %v1246_v29 = vsel %vm70_vm0, %v1244_v27, 0.0 }
 0xa99   :  { %1247 = vadd.xlane.f32.xlu0 %v1246_v29 }
 0xb25   :  { %v1251_v39 = vpop.xlane.xlu1 %1250 }
 0xb26   :  { %v1253_v40 = vmul.f32 0.03125, %v1251_v39  ;;  %v1248_v42 = vpop.xlane.xlu0 %1247 }
 0xb27   :  { %v1252_v41 = vmul.f32 0.03125, %v1248_v42 }
 0xb28   :  { %v1255_v43 = vadd.f32 1e-12, %v1253_v40 }
 0xb29   :  { %v1254_v44 = vadd.f32 1e-12, %v1252_v41 }
 0xb2a   :  { %3151 = vrsqrt.f32 %v1255_v43 }
 0xb2b   :  { %3153 = vrsqrt.f32 %v1254_v44 }
 0xb34   :  { %v3152_v45 = vpop.eup %3151 }
 0xb35   :  { %v3154_v47 = vpop.eup %3153  ;;  %v1259_v48 = vmul.f32 %v3152_v45, %v1243_v24 }
 0xb36   :  { %v1258_v49 = vmul.f32 %v3154_v47, %v1242_v25 }
 0xb37   :  { %v1267_v51 = vmul.f32 %v2655_v46, %v1259_v48 }
 0xb38   :  { %v1266_v53 = vmul.f32 %v2655_v46, %v1258_v49 }
 0xb39   :  { %v3551_v55 = vadd.f32 %v2656_v50, %v1267_v51 }
 0xb3a   :  { %v3549_v54 = vadd.f32 %v2656_v50, %v1266_v53 }
 0xb3c   :  { %2915 = vmatprep.mubr.msk.f32.mxu1 %vm70_vm0, %v3549_v54 }
 0xb3d   :  { %2916 = vmatmul.mubr.msk.f32.vlgmr.msra.gmra.mrb[12].mxu1 %vm70_vm0, %v3551_v55 }
 0xb3e   :  { %2920 = vmatprep.mubr.msk.f32.mxu1 %vm3210_vm1, %v3209_v36 }
 0xc10   :  { %v2917_v57 = vpop.f32.mrb[12].mxu1 }
 0xc11   :  { %v1361_v58 = vpop.f32.mrb[13].mxu1  ;;  %v3568_v60 = vadd.f32 %v2917_v57, %v2662_v56 }
 0xc12   :  { %v3562_v59 = vadd.f32 %v2662_v56, %v1361_v58 }
 0xc14   :  { %1538 = vrot.lane.b32.xlu1 %v3562_v59, %s3211_s27  ;;  %1371 = vrot.lane.b32.xlu0 %v3562_v59, %s3212_s28 }
 0xc18   :  { %1536 = vrot.lane.b32.xlu1 %v3562_v59, %s3213_s4  ;;  %1876 = vrot.lane.b32.xlu0 %v3568_v60, %s3211_s27 }
 0xc1c   :  { %1709 = vrot.lane.b32.xlu1 %v3568_v60, %s3212_s28 }
 0xc20   :  { %1874 = vrot.lane.b32.xlu1 %v3568_v60, %s3213_s4 }
 0xc86   :  { %v1539_v61 = vpop.permute.xlu1 %1538  ;;  %v1372_v62 = vpop.permute.xlu0 %1371 }
 0xc87   :  { %2919 = vmatpush3.xpose.msk.msra.mxu1 %vm210_vm2, %v1372_v62  ;;  %2929 = vmatpush3.xpose.msk.msra.mxu0 %vm210_vm2, %v1539_v61  ;;  %v2677_v62 = vld [vmem:[%s3773_s6 + $0x20] sm:$0xff] }
 0xc88   :  { %2938 = vmatprep.subr.mxu0 %v3209_v36  ;;  %2923 = vmatprep.subr.mxu1 %v3209_v36 }
 0xc8a   :  { %v1537_v63 = vpop.permute.xlu1 %1536  ;;  %2921 = vmatmul.mubr.msk.f32.vlgmr.msra.gmra.mrb[14].mxu1 %vm210_vm2, %v3562_v59  ;;  %v1877_v2 = vpop.permute.xlu0 %1876 }
 0xc8b   :  { %2931 = vmatmul.mubr.msk.f32.vlgmr.msra.gmra.mrb[12].mxu0 %vm210_vm2, %v1537_v63  ;;  %2925 = vmatprep.mubr.msk.f32.mxu1 %vm3210_vm1, %v3209_v36  ;;  %v2678_v63 = vld [vmem:[%s3773_s6 + $0x28] sm:$0xff] }
 0xc8c   :  { %2940 = vmatprep.mubr.msk.f32.mxu0 %vm3210_vm1, %v3209_v36 }
 0xc8e   :  { %v1710_v1 = vpop.permute.xlu1 %1709 }
 0xc8f   :  { %2939 = vmatpush3.xpose.msk.msra.mxu0 %vm210_vm2, %v1710_v1  ;;  %v2679_v1 = vld [vmem:[%s3773_s6 + $0x30] sm:$0xff] }
 0xc90   :  { %2948 = vmatprep.subr.mxu0 %v3209_v36 }
 0xc92   :  { %2941 = vmatmul.mubr.msk.f32.vlgmr.msra.gmra.mrb[14].mxu0 %vm210_vm2, %v3568_v60  ;;  %v1875_v3 = vpop.permute.xlu1 %1874 }
 0xc93   :  { %2949 = vmatpush3.xpose.msk.msra.mxu0 %vm210_vm2, %v1877_v2  ;;  %2950 = vmatprep.mubr.msk.f32.mxu0 %vm3210_vm1, %v3209_v36  ;;  %v3069_v2 = vpack.c.bf16 %v2678_v63, %v2677_v62  ;;  %v2700_v62 = vld [vmem:[%s3779_s12 + $0x58] sm:$0xff] }
 0xc95   :  { %3070 = vmatprep.subr.bf16.mxu0 %v3069_v2 }
 0xc96   :  { %2951 = vmatmul.mubr.msk.f32.vlgmr.msra.gmra.mrb[16].mxu0 %vm210_vm2, %v1875_v3  ;;  %v2680_v3 = vld [vmem:[%s3773_s6 + $0x38] sm:$0xff] }
 0xc97   :  { %3072 = vmatpush3.bf16.msra.mxu0 %v3069_v2  ;;  %v2702_v2 = vld [vmem:[%s3779_s12 + $0x68] sm:$0xff] }
 0xd5d   :  { %v1443_v4 = vpop.f32.mrb[14].mxu1 }
 0xd5e   :  { %v1447_v5 = vmul.f32 0.25, %v1443_v4  ;;  %v2922_v6 = vpop.f32.mrb[15].mxu1  ;;  %v1610_v7 = vpop.f32.mrb[12].mxu0  ;;  %v3073_v4 = vpack.c.bf16 %v2680_v3, %v2679_v1  ;;  %v2701_v1 = vld [vmem:[%s3779_s12 + $0x60] sm:$0xff] }
 0xd5f   :  { %v1614_v8 = vmul.f32 0.25, %v1610_v7  ;;  %v2932_v9 = vpop.f32.mrb[13].mxu0  ;;  %v3093_v3 = vpack.c.bf16 %v2702_v2, %v2701_v1 }
 0xd60   :  { %v1448_v10 = vadd.f32 %v1447_v5, %v3407_v52  ;;  %3074 = vmatprep.subr.bf16.mxu0 %v3073_v4 }
 0xd61   :  { %v1615_v11 = vadd.f32 %v1614_v8, %v3407_v52  ;;  %3076 = vmatpush3.bf16.msra.mxu0 %v3073_v4  ;;  %v2703_v4 = vld [vmem:[%s3779_s12 + $0x70] sm:$0xff] }
 0xd62   :  { %v1449_v12 = vsel %vm291_vm3, %v1448_v10, -inf }
 0xd63   :  { %1450 = vmax.xlane.f32.xlu0 %v1449_v12  ;;  %v1616_v13 = vsel %vm291_vm3, %v1615_v11, -inf }
 0xd64   :  { %1617 = vmax.xlane.f32.xlu1 %v1616_v13 }
 0xd65   :  { %v1781_v14 = vpop.f32.mrb[14].mxu0 }
 0xd66   :  { %v1785_v15 = vmul.f32 0.25, %v1781_v14  ;;  %v2942_v16 = vpop.f32.mrb[15].mxu0 }
 0xd68   :  { %v1786_v17 = vadd.f32 %v1785_v15, %v3413_v0 }
 0xd69   :  { %v1948_v18 = vpop.f32.mrb[16].mxu0 }
 0xd6a   :  { %v1952_v19 = vmul.f32 0.25, %v1948_v18  ;;  %v2952_v20 = vpop.f32.mrb[17].mxu0  ;;  %v1787_v21 = vsel %vm291_vm3, %v1786_v17, -inf }
 0xd6b   :  { %1788 = vmax.xlane.f32.xlu0 %v1787_v21 }
 0xd6c   :  { %v1953_v22 = vadd.f32 %v1952_v19, %v3413_v0 }
 0xd6e   :  { %v1954_v52 = vsel %vm291_vm3, %v1953_v22, -inf }
 0xd6f   :  { %1955 = vmax.xlane.f32.xlu0 %v1954_v52 }
 0xdf0   :  { %v1451_v23 = vpop.xlane.xlu0 %1450 }
 0xdf1   :  { %v1452_v35 = vsub.f32 %v1448_v10, %v1451_v23  ;;  %v1618_v33 = vpop.xlane.xlu1 %1617 }
 0xdf2   :  { %v1619_v24 = vsub.f32 %v1615_v11, %v1618_v33 }
 0xdf3   :  { %v1453_v25 = vmul.f32 1.442695, %v1452_v35 }
 0xdf4   :  { %v1620_v26 = vmul.f32 1.442695, %v1619_v24 }
 0xdf5   :  { %3155 = vpow2.f32 %v1453_v25 }
 0xdf6   :  { %3157 = vpow2.f32 %v1620_v26 }
 0xdf8   :  { %v1789_v27 = vpop.xlane.xlu0 %1788 }
 0xdf9   :  { %v1790_v28 = vsub.f32 %v1786_v17, %v1789_v27  ;;  %v2682_v17 = vld [vmem:[%s3774_s7 + $0x1] ss:$0 sm:$0xff] }
 0xdfb   :  { %v1791_v29 = vmul.f32 1.442695, %v1790_v28 }
 0xdfc   :  { %v1956_v38 = vpop.xlane.xlu0 %1955 }
 0xdfd   :  { %3159 = vpow2.f32 %v1791_v29  ;;  %v1957_v39 = vsub.f32 %v1953_v22, %v1956_v38 }
 0xdff   :  { %v3156_v30 = vpop.eup %3155  ;;  %v1958_v40 = vmul.f32 1.442695, %v1957_v39 }
 0xe00   :  { %v3158_v31 = vpop.eup %3157  ;;  %v1455_v32 = vsel %vm291_vm3, %v3156_v30, 0.0 }
 0xe01   :  { %1456 = vadd.xlane.f32.xlu0 %v1455_v32  ;;  %v1622_v0 = vsel %vm291_vm3, %v3158_v31, 0.0  ;;  %3161 = vpow2.f32 %v1958_v40  ;;  %v2690_v32 = vld [vmem:[%s3777_s10 + $0x28] sm:$0xff] }
 0xe02   :  { %1623 = vadd.xlane.f32.xlu1 %v1622_v0 }
 0xe07   :  { %v3160_v34 = vpop.eup %3159 }
 0xe08   :  { %v1793_v37 = vsel %vm291_vm3, %v3160_v34, 0.0 }
 0xe09   :  { %1794 = vadd.xlane.f32.xlu0 %v1793_v37  ;;  %v2692_v37 = vld [vmem:[%s3777_s10 + $0x38] sm:$0xff] }
 0xe0b   :  { %v3162_v42 = vpop.eup %3161 }
 0xe0c   :  { %v1960_v41 = vsel %vm291_vm3, %v3162_v42, 0.0 }
 0xe13   :  { %1627 = vrot.lane.b32.xlu1 %v3562_v59, %s3214_s21 }
 0xe17   :  { %1798 = vrot.lane.b32.xlu1 %v3568_v60, %s3215_s1 }
 0xe1f   :  { %1460 = vrot.lane.b32.xlu0 %v3562_v59, %s3215_s1 }
 0xe3b   :  { %1961 = vadd.xlane.f32.xlu1 %v1960_v41 }
 0xe4c   :  { %1965 = vrot.lane.b32.xlu1 %v3568_v60, %s3214_s21 }
 0xe8e   :  { %v1457_v43 = vpop.xlane.xlu0 %1456 }
 0xe8f   :  { %3163 = vrcp.f32 %v1457_v43  ;;  %v1624_v44 = vpop.xlane.xlu1 %1623 }
 0xe90   :  { %3165 = vrcp.f32 %v1624_v44 }
 0xe93   :  { %v1628_v48 = vpop.permute.xlu1 %1627 }
 0xe96   :  { %v1795_v45 = vpop.xlane.xlu0 %1794 }
 0xe97   :  { %3167 = vrcp.f32 %v1795_v45  ;;  %v1799_v53 = vpop.permute.xlu1 %1798 }
 0xe99   :  { %v3164_v46 = vpop.eup %3163 }
 0xe9a   :  { %v1459_v47 = vmul.f32 %v3164_v46, %v3156_v30  ;;  %v1461_v49 = vpop.permute.xlu0 %1460  ;;  %v3166_v50 = vpop.eup %3165  ;;  %v2687_v46 = vld [vmem:[%s3775_s8 + $0x1] ss:$0 sm:$0xff] }
 0xe9b   :  { %2924 = vmatpush3.msra.mxu1 %v1461_v49  ;;  %v1626_v51 = vmul.f32 %v3166_v50, %v3158_v31 }
 0xe9c   :  { %2926 = vmatmul.mubr.msk.f32.vlgmr.msra.gmra.mrb[16].mxu1 %vm291_vm3, %v1459_v47  ;;  %2933 = vmatprep.subr.mxu1 %v3209_v36 }
 0xe9d   :  { %2934 = vmatpush3.msra.mxu1 %v1628_v48  ;;  %2935 = vmatprep.mubr.msk.f32.mxu1 %vm3210_vm1, %v3209_v36  ;;  %v2688_v48 = vld [vmem:[%s3776_s9 + $0x1] ss:$0 sm:$0xff] }
 0xe9e   :  { %2943 = vmatprep.subr.mxu1 %v3209_v36 }
 0xea0   :  { %2936 = vmatmul.mubr.msk.f32.vlgmr.msra.gmra.mrb[18].mxu1 %vm291_vm3, %v1626_v51 }
 0xea1   :  { %v3168_v56 = vpop.eup %3167  ;;  %2944 = vmatpush3.msra.mxu1 %v1799_v53  ;;  %2945 = vmatprep.mubr.msk.f32.mxu1 %vm3210_vm1, %v3209_v36 }
 0xea2   :  { %v1797_v57 = vmul.f32 %v3168_v56, %v3160_v34  ;;  %2953 = vmatprep.subr.mxu1 %v3209_v36  ;;  %v2691_v34 = vld [vmem:[%s3777_s10 + $0x30] sm:$0xff] }
 0xea3   :  { %v3081_v38 = vpack.c.bf16 %v2692_v37, %v2691_v34 }
 0xea4   :  { %2946 = vmatmul.mubr.msk.f32.vlgmr.msra.gmra.mrb[20].mxu1 %vm291_vm3, %v1797_v57 }
 0xea5   :  { %2955 = vmatprep.mubr.msk.f32.mxu1 %vm3210_vm1, %v3209_v36 }
 0xec8   :  { %v1962_v58 = vpop.xlane.xlu1 %1961 }
 0xec9   :  { %3169 = vrcp.f32 %v1962_v58  ;;  %v2697_v58 = vld [vmem:[%s3779_s12 + $0x40] sm:$0xff] }
 0xecc   :  { %v1966_v59 = vpop.permute.xlu1 %1965 }
 0xecd   :  { %2954 = vmatpush3.msra.mxu1 %v1966_v59  ;;  %v2698_v59 = vld [vmem:[%s3779_s12 + $0x48] sm:$0xff] }
 0xed3   :  { %v3170_v60 = vpop.eup %3169 }
 0xed4   :  { %v1964_v61 = vmul.f32 %v3170_v60, %v3162_v42  ;;  %v3085_v60 = vpack.c.bf16 %v2698_v59, %v2697_v58  ;;  %v2712_v59 = vld [vmem:[%s3782_s15 + $0x1] ss:$0 sm:$0xff] }
 0xed6   :  { %2956 = vmatmul.mubr.msk.f32.vlgmr.msra.gmra.mrb[22].mxu1 %vm291_vm3, %v1964_v61  ;;  %3086 = vmatprep.subr.bf16.mxu0 %v3085_v60  ;;  %v2699_v61 = vld [vmem:[%s3779_s12 + $0x50] sm:$0xff] }
 0xed7   :  { %v3089_v63 = vpack.c.bf16 %v2700_v62, %v2699_v61 }
 0xf6f   :  { %v1532_v5 = vpop.f32.mrb[16].mxu1 }
 0xf70   :  { %v2927_v6 = vpop.f32.mrb[17].mxu1 }
 0xf73   :  { %v1699_v7 = vpop.f32.mrb[18].mxu1 }
 0xf74   :  { %1704 = vrot.lane.b32.xlu0 %v1699_v7, %s3216_s0  ;;  %v2937_v8 = vpop.f32.mrb[19].mxu1  ;;  %v2694_v7 = vld [vmem:[%s3778_s11 + $0x1] ss:$0 sm:$0xff] }
 0xf77   :  { %v1870_v9 = vpop.f32.mrb[20].mxu1 }
 0xf78   :  { %v2947_v10 = vpop.f32.mrb[21].mxu1 }
 0xfa9   :  { %v2037_v11 = vpop.f32.mrb[22].mxu1 }
 0xfaa   :  { %2042 = vrot.lane.b32.xlu1 %v2037_v11, %s3216_s0  ;;  %v2957_v12 = vpop.f32.mrb[23].mxu1 }
 0xfe6   :  { %v1705_v13 = vpop.permute.xlu0 %1704 }
 0xfe7   :  { %v1707_v14 = vsel %vm210_vm2, %v1532_v5, %v1705_v13  ;;  %v2704_v5 = vld [vmem:[%s3779_s12 + $0x78] sm:$0xff] }
 0xfe8   :  { %2966 = vmatprep.mubr.msk.f32.mxu0 %vm70_vm0, %v1707_v14  ;;  %v3097_v6 = vpack.c.bf16 %v2704_v5, %v2703_v4  ;;  %v2529_v4 = vld [vmem:[%s3785_s18 + $0x8] sm:$0xff]  ;;  %v2530_v5 = vld [vmem:[%s3785_s18 + $0x10] sm:$0xff] }
0x101c   :  { %v2043_v15 = vpop.permute.xlu1 %2042 }
0x101d   :  { %v2045_v16 = vsel %vm210_vm2, %v1870_v9, %v2043_v15 }
0x101e   :  { %2967 = vmatmul.mubr.msk.f32.vlgmr.msra.gmra.mrb[18].mxu0 %vm70_vm0, %v2045_v16 }
0x101f   :  { %3088 = vmatpush3.bf16.msra.mxu0 %v3085_v60 }
0x1020   :  { %3090 = vmatprep.subr.bf16.mxu0 %v3089_v63 }
0x1023   :  { %3092 = vmatpush3.bf16.msra.mxu0 %v3089_v63 }
0x1024   :  { %3094 = vmatprep.subr.bf16.mxu0 %v3093_v3 }
0x1027   :  { %3096 = vmatpush3.bf16.msra.mxu0 %v3093_v3  ;;  %v2528_v3 = vld [vmem:[%s3785_s18] sm:$0xff] }
0x1028   :  { %3098 = vmatprep.subr.bf16.mxu0 %v3097_v6 }
0x102b   :  { %3100 = vmatpush3.bf16.msra.mxu0 %v3097_v6  ;;  %v3108_v6 = vpack.c.bf16 %v2529_v4, %v2528_v3 }
0x10f1   :  { %v2968_v18 = vpop.f32.mrb[18].mxu0 }
0x10f2   :  { %v2137_v19 = vadd.f32 %v2968_v18, %v2682_v17  ;;  %v2131_v20 = vpop.f32.mrb[19].mxu0 }
0x10f3   :  { %v2132_v21 = vadd.f32 %v2682_v17, %v2131_v20 }
0x10f4   :  { %v2141_v22 = vadd.f32 %v2137_v19, %v3551_v55 }
0x10f5   :  { %v2140_v52 = vadd.f32 %v2132_v21, %v3549_v54  ;;  %v2689_v54 = vld [vmem:[%s3777_s10 + $0x20] sm:$0xff] }
0x10f6   :  { %v2149_v23 = vsel %vm70_vm0, %v2141_v22, 0.0  ;;  %v3077_v0 = vpack.c.bf16 %v2690_v32, %v2689_v54 }
0x10f7   :  { %2150 = vadd.xlane.f32.xlu1 %v2149_v23  ;;  %v2146_v35 = vsel %vm70_vm0, %v2140_v52, 0.0 }
0x10f8   :  { %2147 = vadd.xlane.f32.xlu0 %v2146_v35  ;;  %3078 = vmatprep.subr.bf16.mxu1 %v3077_v0 }
0x10f9   :  { %3080 = vmatpush3.bf16.msra.mxu1 %v3077_v0 }
0x10fa   :  { %3082 = vmatprep.subr.bf16.mxu1 %v3081_v38 }
0x10fd   :  { %3084 = vmatpush3.bf16.msra.mxu1 %v3081_v38  ;;  %v2443_v38 = vld [vmem:[%s3783_s16] sm:$0xff] }
0x1184   :  { %v2151_v33 = vpop.xlane.xlu1 %2150 }
0x1185   :  { %v2153_v24 = vmul.f32 0.03125, %v2151_v33  ;;  %v2148_v25 = vpop.xlane.xlu0 %2147 }
0x1186   :  { %v2152_v26 = vmul.f32 0.03125, %v2148_v25 }
0x1187   :  { %v2155_v27 = vsub.f32 %v2141_v22, %v2153_v24  ;;  %v2706_v22 = vld [vmem:[%s3780_s13 + $0x1] ss:$0 sm:$0xff] }
0x1188   :  { %v2154_v28 = vsub.f32 %v2140_v52, %v2152_v26 }
0x1189   :  { %v2157_v31 = vmul.f32 %v2155_v27, %v2155_v27 }
0x118a   :  { %v2156_v29 = vmul.f32 %v2154_v28, %v2154_v28 }
0x118b   :  { %v2161_v55 = vsel %vm70_vm0, %v2157_v31, 0.0 }
0x118c   :  { %v2158_v30 = vsel %vm70_vm0, %v2156_v29, 0.0 }
0x118d   :  { %2159 = vadd.xlane.f32.xlu0 %v2158_v30 }
0x1191   :  { %2162 = vadd.xlane.f32.xlu0 %v2161_v55 }
0x121a   :  { %v2160_v39 = vpop.xlane.xlu0 %2159 }
0x121b   :  { %v2164_v40 = vmul.f32 0.03125, %v2160_v39  ;;  %v2444_v39 = vld [vmem:[%s3783_s16 + $0x8] sm:$0xff] }
0x121d   :  { %v2166_v42 = vadd.f32 1e-12, %v2164_v40  ;;  %v3102_v40 = vpack.c.bf16 %v2444_v39, %v2443_v38 }
0x121e   :  { %v2163_v41 = vpop.xlane.xlu0 %2162 }
0x121f   :  { %3171 = vrsqrt.f32 %v2166_v42  ;;  %v2165_v43 = vmul.f32 0.03125, %v2163_v41  ;;  %v2445_v42 = vld [vmem:[%s3783_s16 + $0x10] sm:$0xff]  ;;  %v2446_v41 = vld [vmem:[%s3783_s16 + $0x18] sm:$0xff] }
0x1221   :  { %v2167_v44 = vadd.f32 1e-12, %v2165_v43  ;;  %v3217_v43 = vmov 0.0|0.0  }
0x1222   :  { %3101 = vmatprep.subr.bf16.mxu1 %v3217_v43 }
0x1223   :  { %3173 = vrsqrt.f32 %v2167_v44  ;;  %v3105_v44 = vpack.c.bf16 %v2446_v41, %v2445_v42 }
0x1229   :  { %v3172_v45 = vpop.eup %3171 }
0x122a   :  { %v2170_v47 = vmul.f32 %v3172_v45, %v2154_v28 }
0x122c   :  { %v2178_v49 = vmul.f32 %v2687_v46, %v2170_v47 }
0x122d   :  { %v3174_v50 = vpop.eup %3173 }
0x122e   :  { %v2171_v51 = vmul.f32 %v3174_v50, %v2155_v27  ;;  %v2186_v53 = vadd.f32 %v2688_v48, %v2178_v49 }
0x1230   :  { %v2179_v56 = vmul.f32 %v2687_v46, %v2171_v51  ;;  %2977 = vmatprep.mubr.msk.f32.mxu1 %vm70_vm0, %v2186_v53 }
0x1232   :  { %v2187_v57 = vadd.f32 %v2688_v48, %v2179_v56 }
0x1234   :  { %2978 = vmatmul.mubr.msk.f32.vlgmr.msra.gmra.mrb[24].mxu1 %vm70_vm0, %v2187_v57 }
0x1235   :  { %3007 = vmatprep.mubr.msk.f32.mxu1 %vm3210_vm1, %v3209_v36  ;;  %3103 = vmatpush3.bf16.msra.mxu1 %v3102_v40 }
0x1236   :  { %3104 = vmatprep.subr.bf16.mxu1 %v3217_v43 }
0x1239   :  { %3106 = vmatpush3.bf16.msra.mxu1 %v3105_v44 }
0x123a   :  { %3107 = vmatprep.subr.bf16.mxu1 %v3217_v43 }
0x1307   :  { %v2979_v8 = vpop.f32.mrb[24].mxu1 }
0x1308   :  { %v2279_v9 = vadd.f32 %v2979_v8, %v2694_v7  ;;  %v2273_v10 = vpop.f32.mrb[25].mxu1 }
0x1309   :  { %v2274_v11 = vadd.f32 %v2694_v7, %v2273_v10  ;;  %v2531_v7 = vld [vmem:[%s3785_s18 + $0x18] sm:$0xff]  ;;  %s3218_s18 = smov [#allocation2]  }
0x130a   :  { %v2285_v12 = vmul.f32 0.70710677, %v2279_v9  ;;  %v2283_v19 = vmul.f32 0.5, %v2279_v9  ;;  %v3111_v8 = vpack.c.bf16 %v2531_v7, %v2530_v5  ;;  %s2619_s5 = sshll.u32 %s3218_s18, 4  ;;  %s2620_s5 = int_to_ptr.vmem [resolvable:$true] %s2619_s5 }
0x130b   :  { %v2284_v13 = vmul.f32 0.70710677, %v2274_v11  ;;  %v2282_v17 = vmul.f32 0.5, %v2274_v11  ;;  %s3185_s11 = scalar_lea.vmem %s2620_s5, 32  ;;  %p3190_p1 = scmp.lt.s32.totalorder %s2620_s5, %s2620_s5 }
0x130c   :  { %3175 = verf.f32 %v2285_v12  ;;  %p3186_p0 = scmp.ne.s32.totalorder %s2620_s5, %s3185_s11  ;;  %p3191_p2 = scmp.lt.s32.totalorder %s3185_s11, %s3185_s11 }
0x130d   :  { %3177 = verf.f32 %v2284_v13  ;;  %v2715_v13 = vld [vmem:[%s3786_s19] ss:$0 sm:$0xff] }
0x130e   :  { %p3192_p3 = por %p3191_p2, %p3190_p1 }
0x1310   :  { %p3193_p4 = pnand %p3192_p3, %p3186_p0 }
0x1316   :  { %v3176_v14 = vpop.eup %3175 }
0x1317   :  { %v3178_v15 = vpop.eup %3177  ;;  %v2289_v16 = vadd.f32 1.0, %v3176_v14 }
0x1318   :  { %v2288_v18 = vadd.f32 1.0, %v3178_v15 }
0x1319   :  { %v2291_v21 = vmul.f32 %v2289_v16, %v2283_v19 }
0x131a   :  { %v2290_v20 = vmul.f32 %v2288_v18, %v2282_v17 }
0x131c   :  { %2996 = vmatprep.mubr.msk.f32.mxu0 %vm1148_vm4, %v2290_v20 }
0x131d   :  { %2997 = vmatmul.mubr.msk.f32.vlgmr.msra.gmra.mrb[20].mxu0 %vm1148_vm4, %v2291_v21 }
0x13f0   :  { %v2998_v52 = vpop.f32.mrb[20].mxu0 }
0x13f1   :  { %v2387_v23 = vadd.f32 %v2998_v52, %v2706_v22  ;;  %v2381_v35 = vpop.f32.mrb[21].mxu0 }
0x13f2   :  { %v2382_v33 = vadd.f32 %v2706_v22, %v2381_v35 }
0x13f3   :  { %v2391_v24 = vadd.f32 %v2387_v23, %v2187_v57 }
0x13f4   :  { %v2390_v25 = vadd.f32 %v2382_v33, %v2186_v53  ;;  %v2711_v53 = vld [vmem:[%s3781_s14 + $0x1] ss:$0 sm:$0xff] }
0x13f5   :  { %v2399_v26 = vsel %vm70_vm0, %v2391_v24, 0.0 }
0x13f6   :  { %2400 = vadd.xlane.f32.xlu0 %v2399_v26  ;;  %v2396_v27 = vsel %vm70_vm0, %v2390_v25, 0.0 }
0x13f7   :  { %2397 = vadd.xlane.f32.xlu1 %v2396_v27 }
0x1483   :  { %v2401_v28 = vpop.xlane.xlu0 %2400 }
0x1484   :  { %v2403_v29 = vmul.f32 0.03125, %v2401_v28  ;;  %v2398_v30 = vpop.xlane.xlu1 %2397 }
0x1485   :  { %v2402_v31 = vmul.f32 0.03125, %v2398_v30 }
0x1486   :  { %v2405_v55 = vsub.f32 %v2391_v24, %v2403_v29 }
0x1487   :  { %v2404_v54 = vsub.f32 %v2390_v25, %v2402_v31 }
0x1488   :  { %v2407_v32 = vmul.f32 %v2405_v55, %v2405_v55 }
0x1489   :  { %v2406_v0 = vmul.f32 %v2404_v54, %v2404_v54 }
0x148a   :  { %v2411_v34 = vsel %vm70_vm0, %v2407_v32, 0.0 }
0x148b   :  { %2412 = vadd.xlane.f32.xlu0 %v2411_v34  ;;  %v2408_v37 = vsel %vm70_vm0, %v2406_v0, 0.0 }
0x148c   :  { %2409 = vadd.xlane.f32.xlu1 %v2408_v37 }
0x1518   :  { %v2413_v45 = vpop.xlane.xlu0 %2412 }
0x1519   :  { %v2415_v46 = vmul.f32 0.03125, %v2413_v45  ;;  %v2410_v47 = vpop.xlane.xlu1 %2409 }
0x151a   :  { %v2414_v48 = vmul.f32 0.03125, %v2410_v47 }
0x151b   :  { %v2417_v49 = vadd.f32 1e-12, %v2415_v46 }
0x151c   :  { %v2416_v50 = vadd.f32 1e-12, %v2414_v48 }
0x151d   :  { %3179 = vrsqrt.f32 %v2417_v49 }
0x151e   :  { %3181 = vrsqrt.f32 %v2416_v50 }
0x1527   :  { %v3180_v51 = vpop.eup %3179 }
0x1528   :  { %v3182_v56 = vpop.eup %3181  ;;  %v2421_v57 = vmul.f32 %v3180_v51, %v2405_v55 }
0x1529   :  { %v2420_v58 = vmul.f32 %v3182_v56, %v2404_v54 }
0x152a   :  { %v2429_v60 = vmul.f32 %v2711_v53, %v2421_v57 }
0x152b   :  { %v2428_v61 = vmul.f32 %v2711_v53, %v2420_v58 }
0x152c   :  { %v2437_v62 = vadd.f32 %v2712_v59, %v2429_v60 }
0x152d   :  { %v2436_v63 = vadd.f32 %v2712_v59, %v2428_v61 }
0x152e   :  { %v2439_v1 = vrot.slane %v2437_v62, 7 }
0x1530   :  { %v2442_v2 = vsel %vm2441_vm5, %v2436_v63, %v2439_v1 }
0x1531   :  { %3008 = vmatmul.mubr.msk.f32.vlgmr.msra.gmra.mrb[26].mxu1 %vm70_vm0, %v2442_v2 }
0x1532   :  { %3018 = vmatprep.mubr.msk.f32.mxu1 %vm3210_vm1, %v3209_v36  ;;  %3109 = vmatpush3.bf16.msra.mxu1 %v3108_v6  ;;  %v2713_v36 = vld [vmem:[%s3784_s17] ss:$0 sm:$0xff] }
0x1533   :  { %3110 = vmatprep.subr.bf16.mxu1 %v3217_v43 }
0x1536   :  { %3112 = vmatpush3.bf16.msra.mxu1 %v3111_v8 }
0x1604   :  { %v2523_v9 = vpop.f32.mrb[26].mxu1 }
0x1605   :  { %v2524_v10 = vadd.f32 %v2713_v36, %v2523_v9  ;;  %v3009_v11 = vpop.f32.mrb[27].mxu1 }
0x1607   :  { %3183 = vtanh.f32 %v2524_v10 }
0x1611   :  { %v3184_v12 = vpop.eup %3183 }
0x1612   :  { %3019 = vmatmul.mubr.msk.f32.vlgmr.msra.gmra.mrb[28].mxu1 %vm70_vm0, %v3184_v12 }
0x16e5   :  { %v2608_v14 = vpop.f32.mrb[28].mxu1 }
0x16e6   :  { %v2609_v15 = vadd.f32 %v2715_v13, %v2608_v14  ;;  %v3020_v16 = vpop.f32.mrb[29].mxu1 }
0x16e8   :  { %2612 = vst [vmem:[#allocation2] sm:$0x3] %v2609_v15 }
0x16e9   :  { %3196 = shalt.err (!%p3193_p4)
}
0x16ea   :  { %s3197_s13 = scalar_lea.hbm %s3787_s20, 32 }
0x16eb   :  { %p3198_p5 = scmp.ne.s32.totalorder %s3787_s20, %s3197_s13  ;;  %p3201_p6 = scmp.lt.u32.totalorder %s3197_s13, %s3787_s20 }
0x16ed   :  { %p3203_p7 = pnand %p3201_p6, %p3198_p5 }
0x16ef   :  { %3206 = shalt.err (!%p3203_p7)
}
0x16f0   :  { %2622 = dma.vmem_to_hbm [thread:$0]  %s2620_s5, 32, %s3787_s20, [#allocation3]  }
0x16f1   :  { %3207 = dma.done.wait [#allocation3], 32  }
0x16f2   :  { %3208 = vsyncadd [#allocation3], 4294967264 }
0x16f3   :  { %2626 = vsyncpa [#allocation3], 1 }

</bundles_post_ra>
